<compile_context>
chip_gen: v7x
topology: tpu7x:2x2x1
jax: 0.10.0
libtpu: 0.0.40
codegen_flags: <defaults>
</compile_context>

<pallas_src>
import numpy as np
import jax
import jax.numpy as jnp
from jax.experimental import pallas as pl
from jax.experimental.pallas import tpu as pltpu


# ----------------------------------------------------------------------------
# Buffer construction (module __init__) — plain numpy, deterministic.
# ----------------------------------------------------------------------------
def get_k_index_product_set(num_k_x: int, num_k_y: int, num_k_z: int) -> np.ndarray:
    xs = np.arange(-num_k_x, num_k_x + 1)
    ys = np.arange(-num_k_y, num_k_y + 1)
    zs = np.arange(-num_k_z, num_k_z + 1)
    # torch.cartesian_prod ordering == meshgrid(indexing='ij') flattened
    prod = np.stack(np.meshgrid(xs, ys, zs, indexing="ij"), axis=-1).reshape(-1, 3)
    prod = prod[prod.shape[0] // 2 + 1:]
    return prod.astype(np.float32)


def _gaussian_rbf(dist: np.ndarray, num_basis: int, cutoff: float) -> np.ndarray:
    offset = np.linspace(0.0, cutoff, num_basis, dtype=np.float64)
    coeff = -0.5 / (offset[1] - offset[0]) ** 2
    return np.exp(coeff * (dist - offset[None, :]) ** 2)


def _polynomial_envelope(dist: np.ndarray, order: int, cutoff: float) -> np.ndarray:
    p = float(order)
    u = dist / cutoff
    env = (1.0
           - (p + 1.0) * (p + 2.0) / 2.0 * u ** p
           + p * (p + 2.0) * u ** (p + 1.0)
           - p * (p + 1.0) / 2.0 * u ** (p + 2.0))
    return np.where(dist < cutoff, env, 0.0)


def get_k_voxel_grid(k_cutoff: float, delta_k: float, num_k_basis: int,
                     k_offset=None):
    num_k = int(k_cutoff / delta_k)
    idx = get_k_index_product_set(num_k, num_k, num_k)
    k_cell = np.eye(3, dtype=np.float64) * delta_k
    k_grid = idx.astype(np.float64) @ k_cell
    k_grid = k_grid[(k_grid ** 2).sum(axis=-1) < k_cutoff ** 2]
    if k_offset is None:
        k_offset = 0.1 if num_k_basis <= 48 else 0.25
    cutoff = k_cutoff + k_offset
    d = np.linalg.norm(k_grid, axis=-1, keepdims=True)            # (K, 1)
    rbf = _gaussian_rbf(d, num_k_basis, cutoff)                    # (K, B)
    env = _polynomial_envelope(d, order=5, cutoff=cutoff)          # (K, 1)
    k_rbf_values = rbf * env
    return k_grid.astype(np.float32), k_rbf_values.astype(np.float32)


def ewald_initial_nonpbc_init(k_cutoff: float, delta_k: float, num_k_basis: int,
                              down_weight, k_offset=None):
    """Module init: build buffers, pre-transpose constants, and precompute the
    input-independent down_projection = k_rbf_values @ W^T once."""
    k_grid_np, k_rbf_np = get_k_voxel_grid(k_cutoff, delta_k, num_k_basis, k_offset)

    down_weight = jnp.asarray(down_weight, jnp.float32)            # (P, B)
    down_projection = jnp.asarray(k_rbf_np) @ down_weight.T        # (K, P), once

    return {
        "kgrid_t": jnp.asarray(k_grid_np.T),        # (3, K) pre-transposed constant
        "num_k": int(k_grid_np.shape[0]),
        "down_projection": down_projection,         # precomputed, reused every fwd
        "k_grid": jnp.asarray(k_grid_np),           # kept for reference checks
        "k_rbf_values": jnp.asarray(k_rbf_np),
    }


# ----------------------------------------------------------------------------
# Pallas kernel: per-call hot path (pos-dependent k_dot_r only)
# ----------------------------------------------------------------------------
def _kdotr_kernel(pos_ref, kgrid_t_ref, kdotr_ref):
    pos = pos_ref[...]                       # (At, 3)   f32
    kg = kgrid_t_ref[...]                    # (3, K)    f32

    # Hoist the three pos-column extracts once per tile; the contraction dim is
    # only 3, so three VPU broadcast multiply-adds beat a 3/256-utilised MXU op.
    px = pos[:, 0:1]
    py = pos[:, 1:2]
    pz = pos[:, 2:3]
    kdotr = px * kg[0:1, :] + py * kg[1:2, :] + pz * kg[2:3, :]     # (At, K)
    kdotr_ref[...] = kdotr.astype(kdotr_ref.dtype)


def _round_up(x: int, m: int) -> int:
    return ((x + m - 1) // m) * m


_A_FASTPATH = 1024            # below this a fused XLA elementwise path is cheaper
_A_TILE_MAX = 4096            # rows per grid step (multiple of 8)
_VMEM_BUFFER_BUDGET = 16 << 20  # bytes of double-buffered blocks (safe on v5e/v6e/v7x)


def ewald_initial_nonpbc_forward(pos, buffers, *, delta_k: float, eps: float = 1e-5):
    """Forward pass. pos: (A, 3). Returns dict matching the PyTorch module."""
    pos = jnp.asarray(pos, jnp.float32)
    A = pos.shape[0]
    kgrid_t = buffers["kgrid_t"]                    # (3, K)
    K = kgrid_t.shape[1]

    # sinc_damping: tiny (A,3)->(A,1) VPU work; jnp.sinc == torch.sinc (and is
    # exactly 1 at 0, matching the reference semantics).  XLA fuses this.
    sinc_damping = jnp.sinc(0.5 * delta_k * pos + eps).prod(axis=-1, keepdims=True)

    if A < _A_FASTPATH:
        # Tiny-A fast path: pallas_call launch overhead would dominate.
        k_dot_r = pos @ kgrid_t                                     # (A, K)
    else:
        # Tile selection:
        #  * VMEM cap: 2 double-buffered blocks x (K lane-padded out row +
        #    lane-padded pos row) must fit the buffer budget.
        #  * round_up(cdiv(A, 4), 8): keep >= 4 grid tiles so the "parallel"
        #    axis can shard across both v7x TensorCores.
        k_lanes = _round_up(K, 128)
        bytes_per_row = 2 * (k_lanes + 128) * 4
        vmem_rows = max(8, (_VMEM_BUFFER_BUDGET // bytes_per_row) // 8 * 8)
        a_tile = max(8, min(_A_TILE_MAX, vmem_rows, _round_up(pl.cdiv(A, 4), 8)))
        n_tiles = pl.cdiv(A, a_tile)

        cost = pl.CostEstimate(
            flops=5 * A * K,
            transcendentals=0,
            bytes_accessed=4 * (A * K + 3 * A + 3 * K),
        )

        # Output is emitted directly as (A, K): no A-padding, no post-kernel
        # slice copy.  Last-dim K equals the full array dim, so the (8,128)
        # block constraint is satisfied; the ragged final row tile is masked.
        k_dot_r = pl.pallas_call(
            _kdotr_kernel,
            out_shape=jax.ShapeDtypeStruct((A, K), jnp.float32),
            grid=(n_tiles,),
            in_specs=[
                pl.BlockSpec((a_tile, 3), lambda i: (i, 0)),
                pl.BlockSpec((3, K), lambda i: (0, 0)),
            ],
            out_specs=pl.BlockSpec((a_tile, K), lambda i: (i, 0)),
            compiler_params=pltpu.CompilerParams(
                dimension_semantics=("parallel",),
                vmem_limit_bytes=32 << 20,
            ),
            cost_estimate=cost,
        )(pos, kgrid_t)

    return {
        "k_dot_r": k_dot_r,                                   # (A, K)
        "sinc_damping": sinc_damping,                         # (A, 1)
        "down_projection": buffers["down_projection"],        # (K, P), from init
    }


# ----------------------------------------------------------------------------
# Pure-JAX reference (for self-check)
# ----------------------------------------------------------------------------
def _reference(pos, k_grid, k_rbf_values, down_weight, delta_k, eps=1e-5):
    k_dot_r = jnp.einsum("ki,ai->ak", k_grid, pos)
    sinc = jnp.sinc(0.5 * delta_k * pos + eps).prod(axis=-1, keepdims=True)
    down = k_rbf_values @ down_weight.T
    return k_dot_r, sinc, down


if __name__ == "__main__":
    # Module hyperparameters (small)
    k_cutoff = 0.6
    delta_k = 0.2
    num_k_basis = 16
    projection_dim = 8
    eps = 1e-5

    key = jax.random.PRNGKey(0)
    key_w, key_pos_big, key_pos_small = jax.random.split(key, 3)

    # Deterministic nn.Linear-style weight (PyTorch uniform init range)
    bound = 1.0 / np.sqrt(num_k_basis)
    down_weight = jax.random.uniform(
        key_w, (projection_dim, num_k_basis), dtype=jnp.float32,
        minval=-bound, maxval=bound)

    # Module init: buffers + pre-transposed k_grid + precomputed down-projection
    buffers = ewald_initial_nonpbc_init(k_cutoff, delta_k, num_k_basis, down_weight)

    # --- Case 1: Pallas path, deliberately non-multiple of the tile (ragged). ---
    pos_big = jax.random.normal(key_pos_big, (2050, 3), dtype=jnp.float32) * 2.0
    data_big = ewald_initial_nonpbc_forward(pos_big, buffers, delta_k=delta_k, eps=eps)
    jax.block_until_ready(data_big)

    ref_kdr, ref_sinc, ref_down = _reference(
        pos_big, buffers["k_grid"], buffers["k_rbf_values"], down_weight, delta_k, eps)
    np.testing.assert_allclose(np.asarray(data_big["k_dot_r"]),
                               np.asarray(ref_kdr), rtol=1e-5, atol=1e-5)
    np.testing.assert_allclose(np.asarray(data_big["sinc_damping"]),
                               np.asarray(ref_sinc), rtol=1e-5, atol=1e-5)
    np.testing.assert_allclose(np.asarray(data_big["down_projection"]),
                               np.asarray(ref_down), rtol=1e-5, atol=1e-5)

    # --- Case 2: tiny-A fast path (pure JAX). ---
    pos_small = jax.random.normal(key_pos_small, (10, 3), dtype=jnp.float32) * 2.0
    data_small = ewald_initial_nonpbc_forward(pos_small, buffers, delta_k=delta_k, eps=eps)
    jax.block_until_ready(data_small)

    ref_kdr_s, ref_sinc_s, _ = _reference(
        pos_small, buffers["k_grid"], buffers["k_rbf_values"], down_weight, delta_k, eps)
    np.testing.assert_allclose(np.asarray(data_small["k_dot_r"]),
                               np.asarray(ref_kdr_s), rtol=1e-5, atol=1e-5)
    np.testing.assert_allclose(np.asarray(data_small["sinc_damping"]),
                               np.asarray(ref_sinc_s), rtol=1e-5, atol=1e-5)

    print("KERNEL_OK")
</pallas_src>

<mosaic_0001>
module attributes {stable_mosaic.version = 11 : i64} {
  func.func @_kdotr_kernel(%arg0: i32, %arg1: memref<520x3xf32, #tpu.memory_space<vmem>>, %arg2: memref<3x46xf32, #tpu.memory_space<vmem>>, %arg3: memref<520x46xf32, #tpu.memory_space<vmem>>) attributes {dimension_semantics = [#tpu.dimension_semantics<parallel>], iteration_bounds = array<i64: 4>, scalar_prefetch = 0 : i64, scratch_operands = 0 : i64, tpu.core_type = #tpu.core_type<tc>, window_params = [{transform_indices = @transform_0, window_bounds = array<i64: 520, 3>}, {pipeline_mode = #tpu.pipeline_mode<synchronous>, transform_indices = @transform_1, window_bounds = array<i64: 3, 46>}, {transform_indices = @transform_2, window_bounds = array<i64: 520, 46>}]} {
    %c0 = arith.constant 0 : index
    %c0_0 = arith.constant 0 : index
    %0 = vector.load %arg1[%c0, %c0_0] : memref<520x3xf32, #tpu.memory_space<vmem>>, vector<520x3xf32>
    %c0_1 = arith.constant 0 : index
    %c0_2 = arith.constant 0 : index
    %1 = vector.load %arg2[%c0_1, %c0_2] : memref<3x46xf32, #tpu.memory_space<vmem>>, vector<3x46xf32>
    %2 = vector.extract_strided_slice %0 {offsets = [0, 0], sizes = [520, 1], strides = [1, 1]} : vector<520x3xf32> to vector<520x1xf32>
    %3 = vector.extract_strided_slice %0 {offsets = [0, 1], sizes = [520, 1], strides = [1, 1]} : vector<520x3xf32> to vector<520x1xf32>
    %4 = vector.extract_strided_slice %0 {offsets = [0, 2], sizes = [520, 1], strides = [1, 1]} : vector<520x3xf32> to vector<520x1xf32>
    %5 = vector.extract_strided_slice %1 {offsets = [0, 0], sizes = [1, 46], strides = [1, 1]} : vector<3x46xf32> to vector<1x46xf32>
    %6 = vector.broadcast %2 : vector<520x1xf32> to vector<520x46xf32>
    %7 = vector.broadcast %5 : vector<1x46xf32> to vector<520x46xf32>
    %8 = arith.mulf %6, %7 : vector<520x46xf32>
    %9 = vector.extract_strided_slice %1 {offsets = [1, 0], sizes = [1, 46], strides = [1, 1]} : vector<3x46xf32> to vector<1x46xf32>
    %10 = vector.broadcast %3 : vector<520x1xf32> to vector<520x46xf32>
    %11 = vector.broadcast %9 : vector<1x46xf32> to vector<520x46xf32>
    %12 = arith.mulf %10, %11 : vector<520x46xf32>
    %13 = arith.addf %8, %12 : vector<520x46xf32>
    %14 = vector.extract_strided_slice %1 {offsets = [2, 0], sizes = [1, 46], strides = [1, 1]} : vector<3x46xf32> to vector<1x46xf32>
    %15 = vector.broadcast %4 : vector<520x1xf32> to vector<520x46xf32>
    %16 = vector.broadcast %14 : vector<1x46xf32> to vector<520x46xf32>
    %17 = arith.mulf %15, %16 : vector<520x46xf32>
    %18 = arith.addf %13, %17 : vector<520x46xf32>
    %c0_3 = arith.constant 0 : index
    %c0_4 = arith.constant 0 : index
    %19 = vector.load %arg3[%c0_3, %c0_4] : memref<520x46xf32, #tpu.memory_space<vmem>>, vector<520x46xf32>
    tpu.vector_store %arg3[%c0_3, %c0_4], %18 {strides = array<i32>} : memref<520x46xf32, #tpu.memory_space<vmem>>, vector<520x46xf32>,
    return
  }
  func.func @transform_0(%arg0: i32) -> (i32, i32) {
    %c0_i32 = arith.constant 0 : i32
    %c0_i32_0 = arith.constant 0 : i32
    return %arg0, %c0_i32 : i32, i32
  }
  func.func @transform_1(%arg0: i32) -> (i32, i32) {
    %c0_i32 = arith.constant 0 : i32
    %c0_i32_0 = arith.constant 0 : i32
    %c0_i32_1 = arith.constant 0 : i32
    return %c0_i32, %c0_i32_0 : i32, i32
  }
  func.func @transform_2(%arg0: i32) -> (i32, i32) {
    %c0_i32 = arith.constant 0 : i32
    %c0_i32_0 = arith.constant 0 : i32
    return %arg0, %c0_i32 : i32, i32
  }
}

</mosaic_0001>

<bundles_post_ra>
// kernel: tpu_custom_call.1
= control target key start
LH: loop header
LB: loop body
LE: loop exit
PB: predicated region body
PF: predicated region fallthrough
CT: control target
= control target key end

     0   :  { %s2173_s9 = smov 0   ;;  %s2175_s10 = smov 0   ;;  %s3535_s0 = inlined_call_operand.vmem [shape: f32[2050,3], index: 0, kind: input, shape index: {}]   ;;  %s3536_s1 = inlined_call_operand.vmem [shape: f32[3,46], index: 1, kind: input, shape index: {}]   ;;  %s3537_s2 = inlined_call_operand.vmem [shape: f32[2050,46], index: 2, kind: output, shape index: {}]  }
   0x1   :  { %s2177_s11 = smov 0  }
   0x2 LB: > { %s2186_s12 = sadd.s32 4294967295, %s2121_s11   ;;  %s2188_s13 = sadd.s32 1, %s2121_s11   ;;  %s2121_s11 = sphi %s2177_s11, %s3763_s11   ;;  %s2117_s10 = sphi %s2175_s10, %s3762_s10   ;;  %s2113_s9 = sphi %s2173_s9, %s3761_s9  }
   0x3   : > { %s63_s14 = ssub.s32 %s2121_s11, %s2188_s13  ;;  %s66_s15 = sadd.s32 1, %s2117_s10 }
   0x4   : > { %p64_p0 = scmp.eq.s32.totalorder %s63_s14, 0  ;;  %p76_p1 = scmp.ne.s32.totalorder %s2117_s10, %s2113_s9 }
   0x5   : > { %p77_p2 = scmp.eq.s32.totalorder %s2186_s12, 3  ;;  %p1949_p3 = scmp.ge.s32.totalorder %s2121_s11, 1 }
   0x6   : > { %s2196_s16 = scalar_select %p64_p0, %s2117_s10, %s66_s15  }
   0x7   : > { %p2198_p4 = por %p77_p2, %p76_p1  ;;  %p121_p5 = scmp.lt.s32.totalorder %s2121_s11, 5 }
   0x9   : > { %p122_p6 = pnand %p1949_p3, %p121_p5 }
   0xb   : > { %125 = sbr.rel (%p122_p6) target bundleno = 622 (0x26e), region = 28 }
  0x12   : > { %s2203_s18 = smul.u32 65, %s2186_s12  ;;  %v2155_v0 = vmov 0   ;;  %s143_s26 = sand.u32 1, %s2113_s9   ;;  %vm1413_vm0 = vcmask 375808  }
  0x13   : > { %2062 = vset.pattern.permute.xlu1 %v2155_v0  ;;  %2061 = vset.pattern.permute.xlu0 %v2155_v0  ;;  %s1969_s27 = smul.u32 520, %s143_s26 }
  0x14   : > { %p151_p7 = scmp.lt.s32.totalorder %s2203_s18, 256  ;;  %s1487_s29 = ssub.s32 (%p2198_p4), 257, %s2203_s18 }
  0x15   : > { %s2894_s28 = scalar_lea.vmem [#allocation2], %s1969_s27   ;;  %s1966_s30 = smul.u32 (%p2198_p4), 520, %s2186_s12 }
  0x16   : > { %s152_s19 = scalar_select %p151_p7, %s2203_s18, 256 }
  0x17   : > { %p1488_p8 = scmp.lt.s32.totalorder (%p2198_p4), %s1487_s29, 65  ;;  %s3336_s5 = scalar_lea.vmem (%p2198_p4), %s3537_s2, %s1966_s30  }
  0x18   : > { %s1950_s20 = sshll.u32 %s152_s19, 3 }
  0x19   : > { %s2210_s23 = scalar_lea.vmem %s3535_s0, %s1950_s20 }
  0x1a   : > { %v2213_v1 = vld [vmem:[%s2210_s23 + $0x10] sm:$0xff]  ;;  %v2216_v2 = vld [vmem:[%s2210_s23] sm:$0xff]  ;;  %v2221_v3 = vld [vmem:[%s2210_s23 + $0x18] sm:$0xff] }
  0x1b   : > { %3558 = vst [vmem:[#allocation3_spill] sm:$0xff] %v2216_v2  ;;  %243 = vperm.xlu1 %2062, %v2213_v1   ;;  %233 = vperm.xlu0 %2061, %v2216_v2   ;;  %v2224_v4 = vld [vmem:[%s2210_s23 + $0x8] sm:$0xff]  ;;  %v2232_v6 = vld [vmem:[%s2210_s23 + $0x20] sm:$0xff]  ;;  %v2237_v7 = vld [vmem:[%s2210_s23 + $0x38] sm:$0xff] }
  0x1c   : > { %v2229_v5 = vld [vmem:[%s2210_s23 + $0x28] sm:$0xff]  ;;  %v2240_v8 = vld [vmem:[%s2210_s23 + $0x30] sm:$0xff]  ;;  %v2248_v10 = vld [vmem:[%s2210_s23 + $0x40] sm:$0xff] }
  0x1d   : > { %v2245_v9 = vld [vmem:[%s2210_s23 + $0x48] sm:$0xff]  ;;  %v2253_v11 = vld [vmem:[%s2210_s23 + $0x58] sm:$0xff]  ;;  %v2256_v12 = vld [vmem:[%s2210_s23 + $0x50] sm:$0xff] }
  0x1e   : > { %v2261_v13 = vld [vmem:[%s2210_s23 + $0x68] sm:$0xff]  ;;  %v2264_v14 = vld [vmem:[%s2210_s23 + $0x60] sm:$0xff]  ;;  %v2269_v15 = vld [vmem:[%s2210_s23 + $0x78] sm:$0xff] }
  0x1f   : > { %248 = vperm.xlu1 %2062, %v2221_v3   ;;  %238 = vperm.xlu0 %2061, %v2224_v4   ;;  %v2272_v16 = vld [vmem:[%s2210_s23 + $0x70] sm:$0xff]  ;;  %v2277_v17 = vld [vmem:[%s2210_s23 + $0x88] sm:$0xff]  ;;  %v2280_v18 = vld [vmem:[%s2210_s23 + $0x80] sm:$0xff] }
  0x20   : > { %v2285_v19 = vld [vmem:[%s2210_s23 + $0x98] sm:$0xff]  ;;  %v2288_v20 = vld [vmem:[%s2210_s23 + $0x90] sm:$0xff]  ;;  %v2293_v21 = vld [vmem:[%s2210_s23 + $0xa8] sm:$0xff] }
  0x21   : > { %v2296_v22 = vld [vmem:[%s2210_s23 + $0xa0] sm:$0xff]  ;;  %v2301_v23 = vld [vmem:[%s2210_s23 + $0xb8] sm:$0xff]  ;;  %v2304_v24 = vld [vmem:[%s2210_s23 + $0xb0] sm:$0xff] }
  0x22   : > { %v2309_v25 = vld [vmem:[%s2210_s23 + $0xc8] sm:$0xff]  ;;  %v2312_v26 = vld [vmem:[%s2210_s23 + $0xc0] sm:$0xff]  ;;  %v2317_v27 = vld [vmem:[%s2210_s23 + $0xd8] sm:$0xff] }
  0x23   : > { %258 = vperm.xlu1 %2062, %v2229_v5   ;;  %253 = vperm.xlu0 %2061, %v2232_v6   ;;  %v2320_v28 = vld [vmem:[%s2210_s23 + $0xd0] sm:$0xff]  ;;  %v2325_v29 = vld [vmem:[%s2210_s23 + $0xe8] sm:$0xff]  ;;  %v2328_v30 = vld [vmem:[%s2210_s23 + $0xe0] sm:$0xff] }
  0x24   : > { %v2333_v31 = vld [vmem:[%s2210_s23 + $0xf8] sm:$0xff]  ;;  %v2336_v32 = vld [vmem:[%s2210_s23 + $0xf0] sm:$0xff]  ;;  %v2341_v33 = vld [vmem:[%s2210_s23 + $0x108] sm:$0xff] }
  0x25   : > { %v2344_v34 = vld [vmem:[%s2210_s23 + $0x100] sm:$0xff]  ;;  %v2349_v35 = vld [vmem:[%s2210_s23 + $0x118] sm:$0xff]  ;;  %v2352_v36 = vld [vmem:[%s2210_s23 + $0x110] sm:$0xff] }
  0x26   : > { %v2357_v37 = vld [vmem:[%s2210_s23 + $0x128] sm:$0xff]  ;;  %v2360_v38 = vld [vmem:[%s2210_s23 + $0x120] sm:$0xff]  ;;  %v2365_v39 = vld [vmem:[%s2210_s23 + $0x138] sm:$0xff] }
  0x27   : > { %268 = vperm.xlu1 %2062, %v2237_v7   ;;  %263 = vperm.xlu0 %2061, %v2240_v8   ;;  %v2368_v40 = vld [vmem:[%s2210_s23 + $0x130] sm:$0xff]  ;;  %v2373_v41 = vld [vmem:[%s2210_s23 + $0x148] sm:$0xff]  ;;  %v2376_v42 = vld [vmem:[%s2210_s23 + $0x140] sm:$0xff] }
  0x28   : > { %v2381_v43 = vld [vmem:[%s2210_s23 + $0x158] sm:$0xff]  ;;  %v2384_v44 = vld [vmem:[%s2210_s23 + $0x150] sm:$0xff]  ;;  %v2389_v45 = vld [vmem:[%s2210_s23 + $0x168] sm:$0xff] }
  0x29   : > { %v2392_v46 = vld [vmem:[%s2210_s23 + $0x160] sm:$0xff]  ;;  %v2397_v47 = vld [vmem:[%s2210_s23 + $0x178] sm:$0xff]  ;;  %v2400_v48 = vld [vmem:[%s2210_s23 + $0x170] sm:$0xff] }
  0x2a   : > { %v2405_v49 = vld [vmem:[%s2210_s23 + $0x188] sm:$0xff]  ;;  %v2408_v50 = vld [vmem:[%s2210_s23 + $0x180] sm:$0xff]  ;;  %v2413_v51 = vld [vmem:[%s2210_s23 + $0x198] sm:$0xff] }
  0x2b   : > { %278 = vperm.xlu1 %2062, %v2245_v9   ;;  %273 = vperm.xlu0 %2061, %v2248_v10   ;;  %3559 = vst [vmem:[#allocation4_spill] sm:$0xff] %v2413_v51  ;;  %v2416_v52 = vld [vmem:[%s2210_s23 + $0x190] sm:$0xff]  ;;  %v2421_v53 = vld [vmem:[%s2210_s23 + $0x1a8] sm:$0xff]  ;;  %v2424_v54 = vld [vmem:[%s2210_s23 + $0x1a0] sm:$0xff] }
  0x2c   : > { %3560 = vst [vmem:[#allocation5_spill] sm:$0xff] %v2421_v53  ;;  %v2429_v55 = vld [vmem:[%s2210_s23 + $0x1b8] sm:$0xff]  ;;  %v2432_v56 = vld [vmem:[%s2210_s23 + $0x1b0] sm:$0xff]  ;;  %v2437_v57 = vld [vmem:[%s2210_s23 + $0x1c8] sm:$0xff] }
  0x2d   : > { %3561 = vst [vmem:[#allocation6_spill] sm:$0xff] %v2429_v55  ;;  %3562 = vst [vmem:[#allocation7_spill] sm:$0xff] %v2432_v56  ;;  %v2440_v58 = vld [vmem:[%s2210_s23 + $0x1c0] sm:$0xff]  ;;  %v2445_v59 = vld [vmem:[%s2210_s23 + $0x1d8] sm:$0xff] }
  0x2e   : > { %3563 = vst [vmem:[#allocation8_spill] sm:$0xff] %v2437_v57  ;;  %3564 = vst [vmem:[#allocation9_spill] sm:$0xff] %v2440_v58  ;;  %v2448_v60 = vld [vmem:[%s2210_s23 + $0x1d0] sm:$0xff]  ;;  %v2453_v61 = vld [vmem:[%s2210_s23 + $0x1e8] sm:$0xff] }
  0x2f   : > { %288 = vperm.xlu1 %2062, %v2253_v11   ;;  %283 = vperm.xlu0 %2061, %v2256_v12   ;;  %3565 = vst [vmem:[#allocation10_spill] sm:$0xff] %v2445_v59  ;;  %3566 = vst [vmem:[#allocation11_spill] sm:$0xff] %v2448_v60  ;;  %v2456_v62 = vld [vmem:[%s2210_s23 + $0x1e0] sm:$0xff]  ;;  %v2461_v63 = vld [vmem:[%s2210_s23 + $0x1f8] sm:$0xff] }
  0x30   : > { %3567 = vst [vmem:[#allocation12_spill] sm:$0xff] %v2453_v61  ;;  %3568 = vst [vmem:[#allocation13_spill] sm:$0xff] %v2456_v62  ;;  %v2464_v0 = vld [vmem:[%s2210_s23 + $0x1f0] sm:$0xff] }
  0x31   : > { %3569 = vst [vmem:[#allocation14_spill] sm:$0xff] %v2461_v63 }
  0x33   : > { %298 = vperm.xlu1 %2062, %v2261_v13   ;;  %293 = vperm.xlu0 %2061, %v2264_v14  }
  0x37   : > { %308 = vperm.xlu1 %2062, %v2269_v15   ;;  %303 = vperm.xlu0 %2061, %v2272_v16  }
  0x3b   : > { %318 = vperm.xlu1 %2062, %v2277_v17   ;;  %313 = vperm.xlu0 %2061, %v2280_v18  }
  0x3f   : > { %328 = vperm.xlu1 %2062, %v2285_v19   ;;  %323 = vperm.xlu0 %2061, %v2288_v20  }
  0x43   : > { %338 = vperm.xlu1 %2062, %v2293_v21   ;;  %333 = vperm.xlu0 %2061, %v2296_v22  }
  0x47   : > { %348 = vperm.xlu1 %2062, %v2301_v23   ;;  %343 = vperm.xlu0 %2061, %v2304_v24  }
  0x4b   : > { %358 = vperm.xlu1 %2062, %v2309_v25   ;;  %353 = vperm.xlu0 %2061, %v2312_v26  }
  0x4f   : > { %368 = vperm.xlu1 %2062, %v2317_v27   ;;  %363 = vperm.xlu0 %2061, %v2320_v28  }
  0x53   : > { %378 = vperm.xlu1 %2062, %v2325_v29   ;;  %373 = vperm.xlu0 %2061, %v2328_v30  }
  0x57   : > { %388 = vperm.xlu1 %2062, %v2333_v31   ;;  %383 = vperm.xlu0 %2061, %v2336_v32  }
  0x5b   : > { %398 = vperm.xlu1 %2062, %v2341_v33   ;;  %393 = vperm.xlu0 %2061, %v2344_v34  }
  0x5f   : > { %408 = vperm.xlu1 %2062, %v2349_v35   ;;  %403 = vperm.xlu0 %2061, %v2352_v36  }
  0x63   : > { %418 = vperm.xlu1 %2062, %v2357_v37   ;;  %413 = vperm.xlu0 %2061, %v2360_v38  }
  0x67   : > { %428 = vperm.xlu1 %2062, %v2365_v39   ;;  %423 = vperm.xlu0 %2061, %v2368_v40  }
  0x6b   : > { %438 = vperm.xlu1 %2062, %v2373_v41   ;;  %433 = vperm.xlu0 %2061, %v2376_v42  }
  0x6f   : > { %448 = vperm.xlu1 %2062, %v2381_v43   ;;  %443 = vperm.xlu0 %2061, %v2384_v44  }
  0x73   : > { %458 = vperm.xlu1 %2062, %v2389_v45   ;;  %453 = vperm.xlu0 %2061, %v2392_v46  }
  0x77   : > { %468 = vperm.xlu1 %2062, %v2397_v47   ;;  %463 = vperm.xlu0 %2061, %v2400_v48  }
  0x7b   : > { %478 = vperm.xlu1 %2062, %v2405_v49   ;;  %473 = vperm.xlu0 %2061, %v2408_v50  }
  0x7f   : > { %488 = vperm.xlu1 %2062, %v2413_v51   ;;  %483 = vperm.xlu0 %2061, %v2416_v52  }
  0x83   : > { %498 = vperm.xlu1 %2062, %v2421_v53   ;;  %493 = vperm.xlu0 %2061, %v2424_v54  }
  0x87   : > { %508 = vperm.xlu1 %2062, %v2429_v55   ;;  %503 = vperm.xlu0 %2061, %v2432_v56  }
  0x8b   : > { %518 = vperm.xlu1 %2062, %v2437_v57   ;;  %513 = vperm.xlu0 %2061, %v2440_v58   ;;  %v2469_v57 = vld [vmem:[%s2210_s23 + $0x200] sm:$0xff]  ;;  %v2156_v58 = vmov 1  }
  0x8f   : > { %528 = vperm.xlu1 %2062, %v2445_v59   ;;  %523 = vperm.xlu0 %2061, %v2448_v60  }
  0x93   : > { %538 = vperm.xlu1 %2062, %v2453_v61   ;;  %533 = vperm.xlu0 %2061, %v2456_v62  }
  0x97   : > { %548 = vperm.xlu1 %2062, %v2461_v63   ;;  %543 = vperm.xlu0 %2061, %v2464_v0  }
  0x9a   : > { %v2471_v59 = vpop.permute.xlu1 %243  ;;  %v2473_v60 = vpop.permute.xlu0 %233 }
  0x9b   : > { %3570 = vst [vmem:[#allocation15_spill] sm:$0xff] %v2471_v59  ;;  %3571 = vst [vmem:[#allocation16_spill] sm:$0xff] %v2473_v60  ;;  %2063 = vset.pattern.permute.xlu1 %v2156_v58  ;;  %553 = vperm.xlu0 %2061, %v2469_v57  }
  0x9c   : > { %626 = vperm.xlu1 %2063, %v2216_v2  }
  0x9e   : > { %v2477_v61 = vpop.permute.xlu1 %248  ;;  %v2479_v62 = vpop.permute.xlu0 %238 }
  0x9f   : > { %3572 = vst [vmem:[#allocation17_spill] sm:$0xff] %v2477_v61  ;;  %3573 = vst [vmem:[#allocation18_spill] sm:$0xff] %v2479_v62  ;;  %2064 = vset.pattern.permute.xlu0 %v2156_v58 }
  0xa0   : > { %634 = vperm.xlu1 %2063, %v2213_v1   ;;  %630 = vperm.xlu0 %2064, %v2224_v4  }
  0xa2   : > { %v2483_v63 = vpop.permute.xlu1 %258  ;;  %v2485_v59 = vpop.permute.xlu0 %253 }
  0xa3   : > { %3574 = vst [vmem:[#allocation19_spill] sm:$0xff] %v2483_v63  ;;  %3575 = vst [vmem:[#allocation20_spill] sm:$0xff] %v2485_v59 }
  0xa4   : > { %638 = vperm.xlu1 %2063, %v2221_v3   ;;  %642 = vperm.xlu0 %2064, %v2232_v6  }
  0xa6   : > { %v2489_v60 = vpop.permute.xlu1 %268  ;;  %v2491_v2 = vpop.permute.xlu0 %263 }
  0xa7   : > { %3576 = vst [vmem:[#allocation21_spill] sm:$0xff] %v2489_v60  ;;  %3577 = vst [vmem:[#allocation22_spill] sm:$0xff] %v2491_v2 }
  0xa8   : > { %646 = vperm.xlu1 %2063, %v2229_v5   ;;  %650 = vperm.xlu0 %2064, %v2240_v8  }
  0xaa   : > { %v2495_v58 = vpop.permute.xlu1 %278  ;;  %v2497_v61 = vpop.permute.xlu0 %273 }
  0xab   : > { %3578 = vst [vmem:[#allocation23_spill] sm:$0xff] %v2495_v58  ;;  %3579 = vst [vmem:[#allocation24_spill] sm:$0xff] %v2497_v61 }
  0xac   : > { %654 = vperm.xlu1 %2063, %v2237_v7   ;;  %658 = vperm.xlu0 %2064, %v2248_v10  }
  0xae   : > { %v2501_v63 = vpop.permute.xlu1 %288  ;;  %v2503_v59 = vpop.permute.xlu0 %283 }
  0xaf   : > { %3580 = vst [vmem:[#allocation25_spill] sm:$0xff] %v2501_v63  ;;  %3581 = vst [vmem:[#allocation26_spill] sm:$0xff] %v2503_v59 }
  0xb0   : > { %662 = vperm.xlu1 %2063, %v2245_v9   ;;  %666 = vperm.xlu0 %2064, %v2256_v12  }
  0xb2   : > { %v2507_v60 = vpop.permute.xlu1 %298  ;;  %v2509_v2 = vpop.permute.xlu0 %293 }
  0xb3   : > { %3582 = vst [vmem:[#allocation27_spill] sm:$0xff] %v2507_v60  ;;  %3583 = vst [vmem:[#allocation28_spill] sm:$0xff] %v2509_v2 }
  0xb4   : > { %670 = vperm.xlu1 %2063, %v2253_v11   ;;  %674 = vperm.xlu0 %2064, %v2264_v14  }
  0xb6   : > { %v2513_v58 = vpop.permute.xlu1 %308  ;;  %v2515_v61 = vpop.permute.xlu0 %303 }
  0xb7   : > { %3584 = vst [vmem:[#allocation29_spill] sm:$0xff] %v2513_v58  ;;  %3585 = vst [vmem:[#allocation30_spill] sm:$0xff] %v2515_v61 }
  0xb8   : > { %678 = vperm.xlu1 %2063, %v2261_v13   ;;  %682 = vperm.xlu0 %2064, %v2272_v16  }
  0xba   : > { %v2519_v63 = vpop.permute.xlu1 %318  ;;  %v2521_v59 = vpop.permute.xlu0 %313 }
  0xbb   : > { %3586 = vst [vmem:[#allocation31_spill] sm:$0xff] %v2519_v63  ;;  %3587 = vst [vmem:[#allocation32_spill] sm:$0xff] %v2521_v59 }
  0xbc   : > { %686 = vperm.xlu1 %2063, %v2269_v15   ;;  %690 = vperm.xlu0 %2064, %v2280_v18  }
  0xbe   : > { %v2525_v60 = vpop.permute.xlu1 %328  ;;  %v2527_v2 = vpop.permute.xlu0 %323 }
  0xbf   : > { %3588 = vst [vmem:[#allocation33_spill] sm:$0xff] %v2525_v60  ;;  %3589 = vst [vmem:[#allocation34_spill] sm:$0xff] %v2527_v2 }
  0xc0   : > { %694 = vperm.xlu1 %2063, %v2277_v17   ;;  %698 = vperm.xlu0 %2064, %v2288_v20  }
  0xc2   : > { %v2531_v58 = vpop.permute.xlu1 %338  ;;  %v2533_v61 = vpop.permute.xlu0 %333 }
  0xc3   : > { %3590 = vst [vmem:[#allocation35_spill] sm:$0xff] %v2531_v58  ;;  %3591 = vst [vmem:[#allocation36_spill] sm:$0xff] %v2533_v61 }
  0xc4   : > { %702 = vperm.xlu1 %2063, %v2285_v19   ;;  %706 = vperm.xlu0 %2064, %v2296_v22  }
  0xc6   : > { %v2537_v63 = vpop.permute.xlu1 %348  ;;  %v2539_v59 = vpop.permute.xlu0 %343 }
  0xc7   : > { %3592 = vst [vmem:[#allocation37_spill] sm:$0xff] %v2537_v63  ;;  %3593 = vst [vmem:[#allocation38_spill] sm:$0xff] %v2539_v59 }
  0xc8   : > { %710 = vperm.xlu1 %2063, %v2293_v21   ;;  %714 = vperm.xlu0 %2064, %v2304_v24  }
  0xca   : > { %v2543_v60 = vpop.permute.xlu1 %358  ;;  %v2545_v2 = vpop.permute.xlu0 %353 }
  0xcb   : > { %3594 = vst [vmem:[#allocation39_spill] sm:$0xff] %v2543_v60  ;;  %3595 = vst [vmem:[#allocation40_spill] sm:$0xff] %v2545_v2 }
  0xcc   : > { %718 = vperm.xlu1 %2063, %v2301_v23   ;;  %722 = vperm.xlu0 %2064, %v2312_v26  }
  0xce   : > { %v2549_v58 = vpop.permute.xlu1 %368  ;;  %v2551_v61 = vpop.permute.xlu0 %363 }
  0xcf   : > { %3596 = vst [vmem:[#allocation41_spill] sm:$0xff] %v2549_v58  ;;  %3597 = vst [vmem:[#allocation42_spill] sm:$0xff] %v2551_v61 }
  0xd0   : > { %726 = vperm.xlu1 %2063, %v2309_v25   ;;  %730 = vperm.xlu0 %2064, %v2320_v28  }
  0xd2   : > { %v2555_v63 = vpop.permute.xlu1 %378  ;;  %v2557_v59 = vpop.permute.xlu0 %373 }
  0xd3   : > { %3598 = vst [vmem:[#allocation43_spill] sm:$0xff] %v2555_v63  ;;  %3599 = vst [vmem:[#allocation44_spill] sm:$0xff] %v2557_v59 }
  0xd4   : > { %734 = vperm.xlu1 %2063, %v2317_v27   ;;  %738 = vperm.xlu0 %2064, %v2328_v30  }
  0xd6   : > { %v2561_v60 = vpop.permute.xlu1 %388  ;;  %v2563_v2 = vpop.permute.xlu0 %383 }
  0xd7   : > { %3600 = vst [vmem:[#allocation45_spill] sm:$0xff] %v2561_v60  ;;  %3601 = vst [vmem:[#allocation46_spill] sm:$0xff] %v2563_v2 }
  0xd8   : > { %742 = vperm.xlu1 %2063, %v2325_v29   ;;  %746 = vperm.xlu0 %2064, %v2336_v32  }
  0xda   : > { %v2567_v58 = vpop.permute.xlu1 %398  ;;  %v2569_v61 = vpop.permute.xlu0 %393 }
  0xdb   : > { %3602 = vst [vmem:[#allocation47_spill] sm:$0xff] %v2567_v58  ;;  %3603 = vst [vmem:[#allocation48_spill] sm:$0xff] %v2569_v61 }
  0xdc   : > { %750 = vperm.xlu1 %2063, %v2333_v31   ;;  %754 = vperm.xlu0 %2064, %v2344_v34  }
  0xde   : > { %v2573_v63 = vpop.permute.xlu1 %408  ;;  %v2575_v59 = vpop.permute.xlu0 %403 }
  0xdf   : > { %3604 = vst [vmem:[#allocation49_spill] sm:$0xff] %v2573_v63  ;;  %3605 = vst [vmem:[#allocation50_spill] sm:$0xff] %v2575_v59 }
  0xe0   : > { %758 = vperm.xlu1 %2063, %v2341_v33   ;;  %762 = vperm.xlu0 %2064, %v2352_v36  }
  0xe2   : > { %v2579_v60 = vpop.permute.xlu1 %418  ;;  %v2581_v2 = vpop.permute.xlu0 %413 }
  0xe3   : > { %3606 = vst [vmem:[#allocation51_spill] sm:$0xff] %v2579_v60  ;;  %3607 = vst [vmem:[#allocation52_spill] sm:$0xff] %v2581_v2 }
  0xe4   : > { %766 = vperm.xlu1 %2063, %v2349_v35   ;;  %770 = vperm.xlu0 %2064, %v2360_v38  }
  0xe6   : > { %v2585_v58 = vpop.permute.xlu1 %428  ;;  %v2587_v61 = vpop.permute.xlu0 %423 }
  0xe7   : > { %3608 = vst [vmem:[#allocation53_spill] sm:$0xff] %v2585_v58  ;;  %3609 = vst [vmem:[#allocation54_spill] sm:$0xff] %v2587_v61 }
  0xe8   : > { %774 = vperm.xlu1 %2063, %v2357_v37   ;;  %778 = vperm.xlu0 %2064, %v2368_v40  }
  0xea   : > { %v2591_v63 = vpop.permute.xlu1 %438  ;;  %v2593_v59 = vpop.permute.xlu0 %433 }
  0xeb   : > { %3610 = vst [vmem:[#allocation55_spill] sm:$0xff] %v2591_v63  ;;  %3611 = vst [vmem:[#allocation56_spill] sm:$0xff] %v2593_v59 }
  0xec   : > { %782 = vperm.xlu1 %2063, %v2365_v39   ;;  %786 = vperm.xlu0 %2064, %v2376_v42  }
  0xee   : > { %v2597_v60 = vpop.permute.xlu1 %448  ;;  %v2599_v2 = vpop.permute.xlu0 %443 }
  0xef   : > { %3612 = vst [vmem:[#allocation57_spill] sm:$0xff] %v2597_v60  ;;  %3613 = vst [vmem:[#allocation58_spill] sm:$0xff] %v2599_v2 }
  0xf0   : > { %790 = vperm.xlu1 %2063, %v2373_v41   ;;  %794 = vperm.xlu0 %2064, %v2384_v44  }
  0xf2   : > { %v2603_v58 = vpop.permute.xlu1 %458  ;;  %v2605_v61 = vpop.permute.xlu0 %453 }
  0xf3   : > { %3614 = vst [vmem:[#allocation59_spill] sm:$0xff] %v2603_v58  ;;  %3615 = vst [vmem:[#allocation60_spill] sm:$0xff] %v2605_v61 }
  0xf4   : > { %798 = vperm.xlu1 %2063, %v2381_v43   ;;  %802 = vperm.xlu0 %2064, %v2392_v46  }
  0xf6   : > { %v2609_v63 = vpop.permute.xlu1 %468  ;;  %v2611_v59 = vpop.permute.xlu0 %463 }
  0xf7   : > { %3616 = vst [vmem:[#allocation61_spill] sm:$0xff] %v2609_v63  ;;  %3617 = vst [vmem:[#allocation62_spill] sm:$0xff] %v2611_v59 }
  0xf8   : > { %806 = vperm.xlu1 %2063, %v2389_v45   ;;  %810 = vperm.xlu0 %2064, %v2400_v48  }
  0xfa   : > { %v2615_v60 = vpop.permute.xlu1 %478  ;;  %v2617_v2 = vpop.permute.xlu0 %473 }
  0xfb   : > { %3618 = vst [vmem:[#allocation63_spill] sm:$0xff] %v2615_v60  ;;  %3619 = vst [vmem:[#allocation64_spill] sm:$0xff] %v2617_v2 }
  0xfc   : > { %814 = vperm.xlu1 %2063, %v2397_v47   ;;  %818 = vperm.xlu0 %2064, %v2408_v50  }
  0xfe   : > { %v2621_v58 = vpop.permute.xlu1 %488  ;;  %v2623_v61 = vpop.permute.xlu0 %483 }
  0xff   : > { %3620 = vst [vmem:[#allocation65_spill] sm:$0xff] %v2621_v58  ;;  %3621 = vst [vmem:[#allocation66_spill] sm:$0xff] %v2623_v61 }
 0x100   : > { %822 = vperm.xlu1 %2063, %v2405_v49   ;;  %826 = vperm.xlu0 %2064, %v2416_v52  }
 0x102   : > { %v2627_v63 = vpop.permute.xlu1 %498  ;;  %v2629_v59 = vpop.permute.xlu0 %493 }
 0x103   : > { %3622 = vst [vmem:[#allocation67_spill] sm:$0xff] %v2627_v63  ;;  %3623 = vst [vmem:[#allocation68_spill] sm:$0xff] %v2629_v59  ;;  %v3628_v63 = vld [vmem:[#allocation9_spill] sm:$0xff] }
 0x104   : > { %830 = vperm.xlu1 %2063, %v2413_v51   ;;  %834 = vperm.xlu0 %2064, %v2424_v54   ;;  %v3631_v51 = vld [vmem:[#allocation8_spill] sm:$0xff] }
 0x106   : > { %v2633_v60 = vpop.permute.xlu1 %508  ;;  %v2635_v2 = vpop.permute.xlu0 %503 }
 0x107   : > { %3624 = vst [vmem:[#allocation69_spill] sm:$0xff] %v2633_v60  ;;  %3625 = vst [vmem:[#allocation70_spill] sm:$0xff] %v2635_v2  ;;  %v3632_v60 = vld [vmem:[#allocation11_spill] sm:$0xff] }
 0x108   : > { %838 = vperm.xlu1 %2063, %v2421_v53   ;;  %842 = vperm.xlu0 %2064, %v2432_v56   ;;  %v3635_v56 = vld [vmem:[#allocation10_spill] sm:$0xff] }
 0x10a   : > { %v2639_v58 = vpop.permute.xlu1 %518  ;;  %v2641_v61 = vpop.permute.xlu0 %513 }
 0x10b   : > { %3626 = vst [vmem:[#allocation71_spill] sm:$0xff] %v2639_v58  ;;  %3627 = vst [vmem:[#allocation72_spill] sm:$0xff] %v2641_v61  ;;  %v3636_v58 = vld [vmem:[#allocation13_spill] sm:$0xff] }
 0x10c   : > { %846 = vperm.xlu1 %2063, %v2429_v55   ;;  %850 = vperm.xlu0 %2064, %v3628_v63   ;;  %v3639_v63 = vld [vmem:[#allocation12_spill] sm:$0xff] }
 0x10e   : > { %v2645_v59 = vpop.permute.xlu1 %528  ;;  %v2647_v62 = vpop.permute.xlu0 %523 }
 0x10f   : > { %3629 = vst [vmem:[#allocation73_spill] sm:$0xff] %v2645_v59  ;;  %3630 = vst [vmem:[#allocation74_spill] sm:$0xff] %v2647_v62 }
 0x110   : > { %854 = vperm.xlu1 %2063, %v3631_v51   ;;  %858 = vperm.xlu0 %2064, %v3632_v60   ;;  %v3641_v51 = vld [vmem:[#allocation14_spill] sm:$0xff] }
 0x112   : > { %v2651_v2 = vpop.permute.xlu1 %538  ;;  %v2653_v53 = vpop.permute.xlu0 %533 }
 0x113   : > { %3633 = vst [vmem:[#allocation11_spill] sm:$0xff] %v2651_v2  ;;  %3634 = vst [vmem:[#allocation75_spill] sm:$0xff] %v2653_v53 }
 0x114   : > { %862 = vperm.xlu1 %2063, %v3635_v56   ;;  %866 = vperm.xlu0 %2064, %v3636_v58   ;;  %v2157_v56 = vmov 2  }
 0x116   : > { %v2657_v61 = vpop.permute.xlu1 %548  ;;  %v2659_v55 = vpop.permute.xlu0 %543 }
 0x117   : > { %3637 = vst [vmem:[#allocation13_spill] sm:$0xff] %v2657_v61  ;;  %3638 = vst [vmem:[#allocation76_spill] sm:$0xff] %v2659_v55  ;;  %v3643_v61 = vld [vmem:[#allocation3_spill] sm:$0xff] }
 0x118   : > { %870 = vperm.xlu1 %2063, %v3639_v63   ;;  %874 = vperm.xlu0 %2064, %v2464_v0  }
 0x11a   : > { %v2663_v59 = vpop.permute.xlu0 %553 }
 0x11b   : > { %3640 = vst [vmem:[#allocation12_spill] sm:$0xff] %v2663_v59  ;;  %v2665_v62 = vpop.permute.xlu1 %626 }
 0x11c   : > { %878 = vperm.xlu1 %2063, %v3641_v51   ;;  %882 = vperm.xlu0 %2064, %v2469_v57  }
 0x11f   : > { %v2669_v2 = vpop.permute.xlu1 %634  ;;  %v2671_v53 = vpop.permute.xlu0 %630 }
 0x120   : > { %3642 = vst [vmem:[#allocation77_spill] sm:$0xff] %v2669_v2  ;;  %2065 = vset.pattern.permute.xlu1 %v2157_v56  ;;  %2066 = vset.pattern.permute.xlu0 %v2157_v56 }
 0x121   : > { %1020 = vperm.xlu1 %2065, %v3643_v61   ;;  %1024 = vperm.xlu0 %2066, %v2224_v4  }
 0x123   : > { %v2675_v55 = vpop.permute.xlu1 %638  ;;  %v2677_v59 = vpop.permute.xlu0 %642 }
 0x125   : > { %1028 = vperm.xlu1 %2065, %v2213_v1   ;;  %1036 = vperm.xlu0 %2066, %v2232_v6  }
 0x127   : > { %v2681_v51 = vpop.permute.xlu1 %646  ;;  %v2683_v2 = vpop.permute.xlu0 %650 }
 0x129   : > { %1032 = vperm.xlu1 %2065, %v2221_v3   ;;  %1044 = vperm.xlu0 %2066, %v2240_v8  }
 0x12b   : > { %v2687_v56 = vpop.permute.xlu1 %654  ;;  %v2689_v61 = vpop.permute.xlu0 %658 }
 0x12d   : > { %1040 = vperm.xlu1 %2065, %v2229_v5   ;;  %1052 = vperm.xlu0 %2066, %v2248_v10  }
 0x12f   : > { %v2693_v4 = vpop.permute.xlu1 %662  ;;  %v2695_v1 = vpop.permute.xlu0 %666 }
 0x131   : > { %1048 = vperm.xlu1 %2065, %v2237_v7   ;;  %1060 = vperm.xlu0 %2066, %v2256_v12  }
 0x133   : > { %v2699_v6 = vpop.permute.xlu1 %670  ;;  %v2701_v3 = vpop.permute.xlu0 %674 }
 0x135   : > { %1056 = vperm.xlu1 %2065, %v2245_v9   ;;  %1068 = vperm.xlu0 %2066, %v2264_v14  }
 0x137   : > { %v2705_v8 = vpop.permute.xlu1 %678  ;;  %v2707_v5 = vpop.permute.xlu0 %682 }
 0x139   : > { %1064 = vperm.xlu1 %2065, %v2253_v11   ;;  %1076 = vperm.xlu0 %2066, %v2272_v16  }
 0x13b   : > { %v2711_v10 = vpop.permute.xlu1 %686  ;;  %v2713_v7 = vpop.permute.xlu0 %690 }
 0x13d   : > { %1072 = vperm.xlu1 %2065, %v2261_v13   ;;  %1084 = vperm.xlu0 %2066, %v2280_v18  }
 0x13f   : > { %v2717_v12 = vpop.permute.xlu1 %694  ;;  %v2719_v9 = vpop.permute.xlu0 %698 }
 0x141   : > { %1080 = vperm.xlu1 %2065, %v2269_v15   ;;  %1092 = vperm.xlu0 %2066, %v2288_v20  }
 0x143   : > { %v2723_v14 = vpop.permute.xlu1 %702  ;;  %v2725_v11 = vpop.permute.xlu0 %706 }
 0x145   : > { %1088 = vperm.xlu1 %2065, %v2277_v17   ;;  %1100 = vperm.xlu0 %2066, %v2296_v22  }
 0x147   : > { %v2729_v16 = vpop.permute.xlu1 %710  ;;  %v2731_v13 = vpop.permute.xlu0 %714 }
 0x149   : > { %1096 = vperm.xlu1 %2065, %v2285_v19   ;;  %1108 = vperm.xlu0 %2066, %v2304_v24  }
 0x14b   : > { %v2735_v18 = vpop.permute.xlu1 %718  ;;  %v2737_v15 = vpop.permute.xlu0 %722 }
 0x14d   : > { %1104 = vperm.xlu1 %2065, %v2293_v21   ;;  %1116 = vperm.xlu0 %2066, %v2312_v26  }
 0x14f   : > { %v2741_v20 = vpop.permute.xlu1 %726  ;;  %v2743_v17 = vpop.permute.xlu0 %730 }
 0x151   : > { %1112 = vperm.xlu1 %2065, %v2301_v23   ;;  %1124 = vperm.xlu0 %2066, %v2320_v28  }
 0x153   : > { %v2747_v22 = vpop.permute.xlu1 %734  ;;  %v2749_v19 = vpop.permute.xlu0 %738 }
 0x155   : > { %1120 = vperm.xlu1 %2065, %v2309_v25   ;;  %1132 = vperm.xlu0 %2066, %v2328_v30  }
 0x157   : > { %v2753_v24 = vpop.permute.xlu1 %742  ;;  %v2755_v21 = vpop.permute.xlu0 %746 }
 0x159   : > { %1128 = vperm.xlu1 %2065, %v2317_v27   ;;  %1140 = vperm.xlu0 %2066, %v2336_v32  }
 0x15b   : > { %v2759_v26 = vpop.permute.xlu1 %750  ;;  %v2761_v23 = vpop.permute.xlu0 %754 }
 0x15d   : > { %1136 = vperm.xlu1 %2065, %v2325_v29   ;;  %1148 = vperm.xlu0 %2066, %v2344_v34  }
 0x15f   : > { %v2765_v28 = vpop.permute.xlu1 %758  ;;  %v2767_v25 = vpop.permute.xlu0 %762 }
 0x161   : > { %1144 = vperm.xlu1 %2065, %v2333_v31   ;;  %1156 = vperm.xlu0 %2066, %v2352_v36  }
 0x163   : > { %v2771_v30 = vpop.permute.xlu1 %766  ;;  %v2773_v27 = vpop.permute.xlu0 %770 }
 0x165   : > { %1152 = vperm.xlu1 %2065, %v2341_v33   ;;  %1164 = vperm.xlu0 %2066, %v2360_v38  }
 0x167   : > { %v2777_v32 = vpop.permute.xlu1 %774  ;;  %v2779_v29 = vpop.permute.xlu0 %778 }
 0x169   : > { %1160 = vperm.xlu1 %2065, %v2349_v35   ;;  %1172 = vperm.xlu0 %2066, %v2368_v40  }
 0x16b   : > { %v2783_v34 = vpop.permute.xlu1 %782  ;;  %v2785_v31 = vpop.permute.xlu0 %786 }
 0x16d   : > { %1168 = vperm.xlu1 %2065, %v2357_v37   ;;  %1180 = vperm.xlu0 %2066, %v2376_v42  }
 0x16f   : > { %v2789_v36 = vpop.permute.xlu1 %790  ;;  %v2791_v33 = vpop.permute.xlu0 %794 }
 0x171   : > { %1176 = vperm.xlu1 %2065, %v2365_v39   ;;  %1188 = vperm.xlu0 %2066, %v2384_v44  }
 0x173   : > { %v2795_v38 = vpop.permute.xlu1 %798  ;;  %v2797_v35 = vpop.permute.xlu0 %802 }
 0x175   : > { %1184 = vperm.xlu1 %2065, %v2373_v41   ;;  %1196 = vperm.xlu0 %2066, %v2392_v46  }
 0x177   : > { %v2801_v40 = vpop.permute.xlu1 %806  ;;  %v2803_v37 = vpop.permute.xlu0 %810 }
 0x178   : > { %3644 = vst [vmem:[#allocation3_spill] sm:$0xff] %v2801_v40 }
 0x179   : > { %1192 = vperm.xlu1 %2065, %v2381_v43   ;;  %1204 = vperm.xlu0 %2066, %v2400_v48  }
 0x17b   : > { %v2807_v42 = vpop.permute.xlu1 %814  ;;  %v2809_v39 = vpop.permute.xlu0 %818 }
 0x17c   : > { %3645 = vst [vmem:[#allocation78_spill] sm:$0xff] %v2807_v42  ;;  %3646 = vst [vmem:[#allocation79_spill] sm:$0xff] %v2809_v39 }
 0x17d   : > { %1200 = vperm.xlu1 %2065, %v2389_v45   ;;  %1212 = vperm.xlu0 %2066, %v2408_v50   ;;  %v3653_v50 = vld [vmem:[#allocation4_spill] sm:$0xff] }
 0x17f   : > { %v2813_v44 = vpop.permute.xlu1 %822  ;;  %v2815_v41 = vpop.permute.xlu0 %826 }
 0x180   : > { %3647 = vst [vmem:[#allocation80_spill] sm:$0xff] %v2813_v44  ;;  %3648 = vst [vmem:[#allocation81_spill] sm:$0xff] %v2815_v41  ;;  %v3654_v44 = vld [vmem:[#allocation7_spill] sm:$0xff] }
 0x181   : > { %1208 = vperm.xlu1 %2065, %v2397_v47   ;;  %1220 = vperm.xlu0 %2066, %v2416_v52   ;;  %v3657_v52 = vld [vmem:[#allocation5_spill] sm:$0xff] }
 0x183   : > { %v2819_v46 = vpop.permute.xlu1 %830  ;;  %v2821_v43 = vpop.permute.xlu0 %834 }
 0x184   : > { %3649 = vst [vmem:[#allocation82_spill] sm:$0xff] %v2819_v46  ;;  %3650 = vst [vmem:[#allocation83_spill] sm:$0xff] %v2821_v43  ;;  %v3658_v46 = vld [vmem:[#allocation9_spill] sm:$0xff]  ;;  %v556_v43 = vlaneseq }
 0x185   : > { %1216 = vperm.xlu1 %2065, %v2405_v49   ;;  %1228 = vperm.xlu0 %2066, %v2424_v54  }
 0x187   : > { %v2825_v48 = vpop.permute.xlu1 %838  ;;  %v2827_v45 = vpop.permute.xlu0 %842 }
 0x188   : > { %3651 = vst [vmem:[#allocation84_spill] sm:$0xff] %v2825_v48  ;;  %3652 = vst [vmem:[#allocation85_spill] sm:$0xff] %v2827_v45  ;;  %v3661_v48 = vld [vmem:[#allocation6_spill] sm:$0xff]  ;;  %v3664_v45 = vld [vmem:[#allocation8_spill] sm:$0xff] }
 0x189   : > { %1224 = vperm.xlu1 %2065, %v3653_v50   ;;  %1236 = vperm.xlu0 %2066, %v3654_v44   ;;  %v557_v50 = vshrl.u32 %v556_v43, 7 }
 0x18b   : > { %v2831_v41 = vpop.permute.xlu1 %846  ;;  %v2833_v47 = vpop.permute.xlu0 %850 }
 0x18c   : > { %3655 = vst [vmem:[#allocation4_spill] sm:$0xff] %v2831_v41  ;;  %3656 = vst [vmem:[#allocation7_spill] sm:$0xff] %v2833_v47  ;;  %v887_v47 = vsub.s32 1, %v557_v50 }
 0x18d   : > { %1232 = vperm.xlu1 %2065, %v3657_v52   ;;  %1244 = vperm.xlu0 %2066, %v3658_v46   ;;  %v230_v46 = vld [vmem:[%s3536_s1] sm:$0x7] }
 0x18e   : > { %v2856_v43 = vrot.slane %v230_v46, %v887_v47 }
 0x18f   : > { %v2837_v49 = vpop.permute.xlu1 %854  ;;  %v2839_v54 = vpop.permute.xlu0 %858 }
 0x190   : > { %3659 = vst [vmem:[#allocation5_spill] sm:$0xff] %v2837_v49  ;;  %3660 = vst [vmem:[#allocation9_spill] sm:$0xff] %v2839_v54  ;;  %v3667_v49 = vld [vmem:[#allocation10_spill] sm:$0xff] }
 0x191   : > { %1240 = vperm.xlu1 %2065, %v3661_v48   ;;  %1252 = vperm.xlu0 %2066, %v3632_v60   ;;  %v558_v60 = vsub.s32 0, %v557_v50 }
 0x193   : > { %v2843_v44 = vpop.permute.xlu1 %862  ;;  %v2845_v41 = vpop.permute.xlu0 %866 }
 0x194   : > { %3662 = vst [vmem:[#allocation6_spill] sm:$0xff] %v2843_v44  ;;  %3663 = vst [vmem:[#allocation86_spill] sm:$0xff] %v2845_v41  ;;  %v1281_v44 = vsub.s32 2, %v557_v50  ;;  %v3671_v50 = vld [vmem:[#allocation18_spill] sm:$0xff] }
 0x195   : > { %1248 = vperm.xlu1 %2065, %v3664_v45   ;;  %1260 = vperm.xlu0 %2066, %v3636_v58   ;;  %v2865_v58 = vrot.slane %v230_v46, %v558_v60 }
 0x196   : > { %v2873_v47 = vrot.slane %v230_v46, %v1281_v44  ;;  %v3673_v46 = vld [vmem:[#allocation14_spill] sm:$0xff] }
 0x197   : > { %v2852_v52 = vpop.permute.xlu1 %870  ;;  %v2854_v48 = vpop.permute.xlu0 %874  ;;  %v561_v60 = vmul.f32 %v2865_v58, %v3671_v50 }
 0x198   : > { %3665 = vst [vmem:[#allocation8_spill] sm:$0xff] %v2852_v52  ;;  %3666 = vst [vmem:[#allocation87_spill] sm:$0xff] %v2854_v48  ;;  %v889_v52 = vmul.f32 %v2856_v43, %v2665_v62  ;;  %v890_v48 = vmul.f32 %v2856_v43, %v2671_v53 }
 0x199   : > { %1256 = vperm.xlu1 %2065, %v3667_v49   ;;  %1268 = vperm.xlu0 %2066, %v2464_v0   ;;  %v3670_v0 = vld [vmem:[#allocation16_spill] sm:$0xff] }
 0x19a   : > { %v560_v49 = vmul.f32 %v2865_v58, %v3670_v0  ;;  %v955_v53 = vadd.f32 %v890_v48, %v561_v60  ;;  %v3674_v0 = vld [vmem:[#allocation15_spill] sm:$0xff]  ;;  %v892_v48 = vmul.f32 %v2856_v43, %v2675_v55 }
 0x19b   : > { %v2860_v41 = vpop.permute.xlu1 %878  ;;  %v2862_v45 = vpop.permute.xlu0 %882  ;;  %v562_v39 = vmul.f32 %v2865_v58, %v3674_v0 }
 0x19c   : > { %3668 = vst [vmem:[#allocation10_spill] sm:$0xff] %v2860_v41  ;;  %3669 = vst [vmem:[#allocation88_spill] sm:$0xff] %v2862_v45  ;;  %v954_v41 = vadd.f32 %v889_v52, %v560_v49  ;;  %v3672_v45 = vld [vmem:[#allocation77_spill] sm:$0xff]  ;;  %v3675_v52 = vld [vmem:[#allocation20_spill] sm:$0xff] }
 0x19d   : > { %1264 = vperm.xlu1 %2065, %v3639_v63   ;;  %1276 = vperm.xlu0 %2066, %v2469_v57   ;;  %v891_v62 = vmul.f32 %v2856_v43, %v3672_v45  ;;  %v893_v63 = vmul.f32 %v2856_v43, %v2677_v59  ;;  %v564_v49 = vmul.f32 %v2865_v58, %v3675_v52 }
 0x19f   : > { %v956_v40 = vadd.f32 %v891_v62, %v562_v39 }
 0x1a0   : > { %v1021_v54 = vpop.permute.xlu1 %1020  ;;  %v1025_v42 = vpop.permute.xlu0 %1024 }
 0x1a1   : > { %v1283_v57 = vmul.f32 %v2873_v47, %v1021_v54  ;;  %v1284_v44 = vmul.f32 %v2873_v47, %v1025_v42  ;;  %1272 = vperm.xlu1 %2065, %v3673_v46   ;;  %v958_v54 = vadd.f32 %v893_v63, %v564_v49  ;;  %v895_v42 = vmul.f32 %v2856_v43, %v2683_v2 }
 0x1a2   : > { %v894_v46 = vmul.f32 %v2856_v43, %v2681_v51  ;;  %v3679_v51 = vld [vmem:[#allocation24_spill] sm:$0xff] }
 0x1a3   : > { %v1348_v45 = vadd.f32 %v1283_v57, %v954_v41  ;;  %v1349_v50 = vadd.f32 %v1284_v44, %v955_v53  ;;  %v3676_v41 = vld [vmem:[#allocation17_spill] sm:$0xff]  ;;  %v3677_v53 = vld [vmem:[#allocation22_spill] sm:$0xff] }
 0x1a4   : > { %v1029_v59 = vpop.permute.xlu1 %1028  ;;  %v1037_v60 = vpop.permute.xlu0 %1036  ;;  %v563_v62 = vmul.f32 %v2865_v58, %v3676_v41  ;;  %v566_v2 = vmul.f32 %v2865_v58, %v3677_v53  ;;  %v899_v53 = vmul.f32 %v2856_v43, %v2695_v1  ;;  %v898_v1 = vmul.f32 %v2856_v43, %v2693_v4  ;;  %v3683_v4 = vld [vmem:[#allocation28_spill] sm:$0xff] }
 0x1a5   : > { %1414 = vst.msk [vmem:[%s2894_s28] sm:$0xff] %vm1413_vm0, %v1348_v45  ;;  %1415 = vst.msk [vmem:[%s2894_s28 + $0x8] sm:$0xff] %vm1413_vm0, %v1349_v50  ;;  %v1285_v39 = vmul.f32 %v2873_v47, %v1029_v59  ;;  %v1287_v55 = vmul.f32 %v2873_v47, %v1037_v60  ;;  %v897_v45 = vmul.f32 %v2856_v43, %v2689_v61 }
 0x1a6   : > { %v957_v44 = vadd.f32 %v892_v48, %v563_v62  ;;  %v960_v49 = vadd.f32 %v895_v42, %v566_v2  ;;  %v3678_v48 = vld [vmem:[#allocation19_spill] sm:$0xff]  ;;  %v568_v60 = vmul.f32 %v2865_v58, %v3679_v51  ;;  %v896_v61 = vmul.f32 %v2856_v43, %v2687_v56  ;;  %v3681_v56 = vld [vmem:[#allocation26_spill] sm:$0xff] }
 0x1a7   : > { %v1350_v63 = vadd.f32 %v1285_v39, %v956_v40  ;;  %v1352_v57 = vadd.f32 %v1287_v55, %v958_v54  ;;  %v565_v59 = vmul.f32 %v2865_v58, %v3678_v48  ;;  %v901_v48 = vmul.f32 %v2856_v43, %v2701_v3 }
 0x1a8   : > { %v1033_v0 = vpop.permute.xlu1 %1032  ;;  %v1045_v52 = vpop.permute.xlu0 %1044  ;;  %v962_v62 = vadd.f32 %v897_v45, %v568_v60  ;;  %v3682_v60 = vld [vmem:[#allocation23_spill] sm:$0xff]  ;;  %v900_v3 = vmul.f32 %v2856_v43, %v2699_v6  ;;  %v3685_v6 = vld [vmem:[#allocation30_spill] sm:$0xff] }
 0x1a9   : > { %1416 = vst.msk [vmem:[%s2894_s28 + $0x10] sm:$0xff] %vm1413_vm0, %v1350_v63  ;;  %1418 = vst.msk [vmem:[%s2894_s28 + $0x20] sm:$0xff] %vm1413_vm0, %v1352_v57  ;;  %v1286_v50 = vmul.f32 %v2873_v47, %v1033_v0  ;;  %v1289_v40 = vmul.f32 %v2873_v47, %v1045_v52  ;;  %v959_v39 = vadd.f32 %v894_v46, %v565_v59  ;;  %v3680_v57 = vld [vmem:[#allocation21_spill] sm:$0xff] }
 0x1aa   : > { %v570_v46 = vmul.f32 %v2865_v58, %v3681_v56 }
 0x1ab   : > { %v1351_v54 = vadd.f32 %v1286_v50, %v957_v44  ;;  %v1354_v42 = vadd.f32 %v1289_v40, %v960_v49  ;;  %v567_v44 = vmul.f32 %v2865_v58, %v3680_v57 }
 0x1ac   : > { %v1041_v55 = vpop.permute.xlu1 %1040  ;;  %v1053_v41 = vpop.permute.xlu0 %1052  ;;  %v964_v40 = vadd.f32 %v899_v53, %v570_v46  ;;  %v574_v46 = vmul.f32 %v2865_v58, %v3685_v6 }
 0x1ad   : > { %1417 = vst.msk [vmem:[%s2894_s28 + $0x18] sm:$0xff] %vm1413_vm0, %v1351_v54  ;;  %1420 = vst.msk [vmem:[%s2894_s28 + $0x30] sm:$0xff] %vm1413_vm0, %v1354_v42  ;;  %v1288_v2 = vmul.f32 %v2873_v47, %v1041_v55  ;;  %v1291_v63 = vmul.f32 %v2873_v47, %v1053_v41  ;;  %v961_v49 = vadd.f32 %v896_v61, %v567_v44  ;;  %v3684_v44 = vld [vmem:[#allocation25_spill] sm:$0xff] }
 0x1ae   : > { %v569_v54 = vmul.f32 %v2865_v58, %v3682_v60  ;;  %v572_v42 = vmul.f32 %v2865_v58, %v3683_v4  ;;  %v571_v56 = vmul.f32 %v2865_v58, %v3684_v44 }
 0x1af   : > { %v1353_v0 = vadd.f32 %v1288_v2, %v959_v39  ;;  %v1356_v52 = vadd.f32 %v1291_v63, %v962_v62  ;;  %v903_v2 = vmul.f32 %v2856_v43, %v2707_v5  ;;  %v902_v5 = vmul.f32 %v2856_v43, %v2705_v8  ;;  %v3687_v8 = vld [vmem:[#allocation32_spill] sm:$0xff] }
 0x1b0   : > { %v1049_v45 = vpop.permute.xlu1 %1048  ;;  %v1061_v50 = vpop.permute.xlu0 %1060  ;;  %v963_v55 = vadd.f32 %v898_v1, %v569_v54  ;;  %v966_v53 = vadd.f32 %v901_v48, %v572_v42  ;;  %v576_v54 = vmul.f32 %v2865_v58, %v3687_v8 }
 0x1b1   : > { %1419 = vst.msk [vmem:[%s2894_s28 + $0x28] sm:$0xff] %vm1413_vm0, %v1353_v0  ;;  %1422 = vst.msk [vmem:[%s2894_s28 + $0x40] sm:$0xff] %vm1413_vm0, %v1356_v52  ;;  %v1290_v59 = vmul.f32 %v2873_v47, %v1049_v45  ;;  %v1293_v51 = vmul.f32 %v2873_v47, %v1061_v50  ;;  %v968_v50 = vadd.f32 %v903_v2, %v574_v46  ;;  %v3688_v2 = vld [vmem:[#allocation29_spill] sm:$0xff] }
 0x1b3   : > { %v1355_v39 = vadd.f32 %v1290_v59, %v961_v49  ;;  %v1358_v61 = vadd.f32 %v1293_v51, %v964_v40  ;;  %v965_v49 = vadd.f32 %v900_v3, %v571_v56  ;;  %v905_v40 = vmul.f32 %v2856_v43, %v2713_v7  ;;  %v3686_v51 = vld [vmem:[#allocation27_spill] sm:$0xff] }
 0x1b4   : > { %v1057_v41 = vpop.permute.xlu1 %1056  ;;  %v1069_v62 = vpop.permute.xlu0 %1068  ;;  %v573_v60 = vmul.f32 %v2865_v58, %v3686_v51  ;;  %v904_v7 = vmul.f32 %v2856_v43, %v2711_v10  ;;  %v3689_v10 = vld [vmem:[#allocation34_spill] sm:$0xff] }
 0x1b5   : > { %1421 = vst.msk [vmem:[%s2894_s28 + $0x38] sm:$0xff] %vm1413_vm0, %v1355_v39  ;;  %1424 = vst.msk [vmem:[%s2894_s28 + $0x50] sm:$0xff] %vm1413_vm0, %v1358_v61  ;;  %v1292_v63 = vmul.f32 %v2873_v47, %v1057_v41  ;;  %v1295_v57 = vmul.f32 %v2873_v47, %v1069_v62  ;;  %v970_v3 = vadd.f32 %v905_v40, %v576_v54 }
 0x1b6   : > { %v967_v39 = vadd.f32 %v902_v5, %v573_v60  ;;  %v907_v41 = vmul.f32 %v2856_v43, %v2719_v9  ;;  %v906_v9 = vmul.f32 %v2856_v43, %v2717_v12  ;;  %v3691_v12 = vld [vmem:[#allocation36_spill] sm:$0xff] }
 0x1b7   : > { %v1357_v0 = vadd.f32 %v1292_v63, %v963_v55  ;;  %v1360_v52 = vadd.f32 %v1295_v57, %v966_v53  ;;  %v575_v63 = vmul.f32 %v2865_v58, %v3688_v2  ;;  %v578_v57 = vmul.f32 %v2865_v58, %v3689_v10 }
 0x1b8   : > { %v1065_v1 = vpop.permute.xlu1 %1064  ;;  %v1077_v45 = vpop.permute.xlu0 %1076  ;;  %v580_v40 = vmul.f32 %v2865_v58, %v3691_v12  ;;  %v913_v10 = vmul.f32 %v2856_v43, %v2737_v15  ;;  %v912_v15 = vmul.f32 %v2856_v43, %v2735_v18  ;;  %v3697_v18 = vld [vmem:[#allocation42_spill] sm:$0xff] }
 0x1b9   : > { %1423 = vst.msk [vmem:[%s2894_s28 + $0x48] sm:$0xff] %vm1413_vm0, %v1357_v0  ;;  %1426 = vst.msk [vmem:[%s2894_s28 + $0x60] sm:$0xff] %vm1413_vm0, %v1360_v52  ;;  %v1294_v48 = vmul.f32 %v2873_v47, %v1065_v1  ;;  %v1297_v59 = vmul.f32 %v2873_v47, %v1077_v45  ;;  %v969_v6 = vadd.f32 %v904_v7, %v575_v63  ;;  %v3690_v45 = vld [vmem:[#allocation31_spill] sm:$0xff]  ;;  %v3692_v7 = vld [vmem:[#allocation33_spill] sm:$0xff] }
 0x1ba   : > { %v972_v52 = vadd.f32 %v907_v41, %v578_v57 }
 0x1bb   : > { %v1359_v4 = vadd.f32 %v1294_v48, %v965_v49  ;;  %v1362_v42 = vadd.f32 %v1297_v59, %v968_v50  ;;  %v909_v49 = vmul.f32 %v2856_v43, %v2725_v11  ;;  %v577_v50 = vmul.f32 %v2865_v58, %v3690_v45 }
 0x1bc   : > { %v1073_v61 = vpop.permute.xlu1 %1072  ;;  %v1085_v55 = vpop.permute.xlu0 %1084  ;;  %v908_v11 = vmul.f32 %v2856_v43, %v2723_v14  ;;  %v3693_v14 = vld [vmem:[#allocation38_spill] sm:$0xff]  ;;  %v915_v45 = vmul.f32 %v2856_v43, %v2743_v17  ;;  %v914_v17 = vmul.f32 %v2856_v43, %v2741_v20  ;;  %v3699_v20 = vld [vmem:[#allocation44_spill] sm:$0xff] }
 0x1bd   : > { %1425 = vst.msk [vmem:[%s2894_s28 + $0x58] sm:$0xff] %vm1413_vm0, %v1359_v4  ;;  %1428 = vst.msk [vmem:[%s2894_s28 + $0x70] sm:$0xff] %vm1413_vm0, %v1362_v42  ;;  %v1296_v62 = vmul.f32 %v2873_v47, %v1073_v61  ;;  %v1299_v53 = vmul.f32 %v2873_v47, %v1085_v55  ;;  %v971_v51 = vadd.f32 %v906_v9, %v577_v50 }
 0x1be   : > { %v974_v54 = vadd.f32 %v909_v49, %v580_v40  ;;  %v911_v4 = vmul.f32 %v2856_v43, %v2731_v13  ;;  %v579_v61 = vmul.f32 %v2865_v58, %v3692_v7  ;;  %v582_v55 = vmul.f32 %v2865_v58, %v3693_v14  ;;  %v3696_v40 = vld [vmem:[#allocation37_spill] sm:$0xff] }
 0x1bf   : > { %v1361_v44 = vadd.f32 %v1296_v62, %v967_v39  ;;  %v1364_v56 = vadd.f32 %v1299_v53, %v970_v3  ;;  %v910_v13 = vmul.f32 %v2856_v43, %v2729_v16  ;;  %v3695_v16 = vld [vmem:[#allocation40_spill] sm:$0xff] }
 0x1c0   : > { %v1081_v46 = vpop.permute.xlu1 %1080  ;;  %v1093_v0 = vpop.permute.xlu0 %1092  ;;  %v973_v62 = vadd.f32 %v908_v11, %v579_v61  ;;  %v976_v63 = vadd.f32 %v911_v4, %v582_v55  ;;  %v584_v9 = vmul.f32 %v2865_v58, %v3695_v16  ;;  %v3698_v61 = vld [vmem:[#allocation39_spill] sm:$0xff]  ;;  %v588_v55 = vmul.f32 %v2865_v58, %v3699_v20 }
 0x1c1   : > { %1427 = vst.msk [vmem:[%s2894_s28 + $0x68] sm:$0xff] %vm1413_vm0, %v1361_v44  ;;  %1430 = vst.msk [vmem:[%s2894_s28 + $0x80] sm:$0xff] %vm1413_vm0, %v1364_v56  ;;  %v1298_v5 = vmul.f32 %v2873_v47, %v1081_v46  ;;  %v1301_v1 = vmul.f32 %v2873_v47, %v1093_v0  ;;  %v3694_v56 = vld [vmem:[#allocation35_spill] sm:$0xff]  ;;  %v585_v14 = vmul.f32 %v2865_v58, %v3698_v61 }
 0x1c3   : > { %v1363_v48 = vadd.f32 %v1298_v5, %v969_v6  ;;  %v1366_v59 = vadd.f32 %v1301_v1, %v972_v52  ;;  %v581_v6 = vmul.f32 %v2865_v58, %v3694_v56  ;;  %v978_v1 = vadd.f32 %v913_v10, %v584_v9 }
 0x1c4   : > { %v1089_v60 = vpop.permute.xlu1 %1088  ;;  %v1101_v8 = vpop.permute.xlu0 %1100 }
 0x1c5   : > { %1429 = vst.msk [vmem:[%s2894_s28 + $0x78] sm:$0xff] %vm1413_vm0, %v1363_v48  ;;  %1432 = vst.msk [vmem:[%s2894_s28 + $0x90] sm:$0xff] %vm1413_vm0, %v1366_v59  ;;  %v1300_v42 = vmul.f32 %v2873_v47, %v1089_v60  ;;  %v1303_v39 = vmul.f32 %v2873_v47, %v1101_v8  ;;  %v975_v52 = vadd.f32 %v910_v13, %v581_v6 }
 0x1c6   : > { %v583_v48 = vmul.f32 %v2865_v58, %v3696_v40  ;;  %v586_v59 = vmul.f32 %v2865_v58, %v3697_v18 }
 0x1c7   : > { %v1365_v3 = vadd.f32 %v1300_v42, %v971_v51  ;;  %v1368_v41 = vadd.f32 %v1303_v39, %v974_v54  ;;  %v917_v42 = vmul.f32 %v2856_v43, %v2749_v19  ;;  %v916_v19 = vmul.f32 %v2856_v43, %v2747_v22  ;;  %v3701_v22 = vld [vmem:[#allocation46_spill] sm:$0xff] }
 0x1c8   : > { %v1097_v53 = vpop.permute.xlu1 %1096  ;;  %v1109_v2 = vpop.permute.xlu0 %1108  ;;  %v977_v60 = vadd.f32 %v912_v15, %v583_v48  ;;  %v980_v4 = vadd.f32 %v915_v45, %v586_v59  ;;  %v590_v6 = vmul.f32 %v2865_v58, %v3701_v22  ;;  %v3702_v45 = vld [vmem:[#allocation43_spill] sm:$0xff]  ;;  %v927_v22 = vmul.f32 %v2856_v43, %v2779_v29 }
 0x1c9   : > { %1431 = vst.msk [vmem:[%s2894_s28 + $0x88] sm:$0xff] %vm1413_vm0, %v1365_v3  ;;  %1434 = vst.msk [vmem:[%s2894_s28 + $0xa0] sm:$0xff] %vm1413_vm0, %v1368_v41  ;;  %v1302_v57 = vmul.f32 %v2873_v47, %v1097_v53  ;;  %v1305_v44 = vmul.f32 %v2873_v47, %v1109_v2  ;;  %v982_v2 = vadd.f32 %v917_v42, %v588_v55 }
 0x1ca   : > { %v926_v29 = vmul.f32 %v2856_v43, %v2777_v32  ;;  %v3711_v32 = vld [vmem:[#allocation56_spill] sm:$0xff] }
 0x1cb   : > { %v1367_v46 = vadd.f32 %v1302_v57, %v973_v62  ;;  %v1370_v0 = vadd.f32 %v1305_v44, %v976_v63  ;;  %v979_v62 = vadd.f32 %v914_v17, %v585_v14  ;;  %v919_v63 = vmul.f32 %v2856_v43, %v2755_v21  ;;  %v3700_v44 = vld [vmem:[#allocation41_spill] sm:$0xff] }
 0x1cc   : > { %v1105_v49 = vpop.permute.xlu1 %1104  ;;  %v1117_v5 = vpop.permute.xlu0 %1116  ;;  %v587_v56 = vmul.f32 %v2865_v58, %v3700_v44  ;;  %v918_v21 = vmul.f32 %v2856_v43, %v2753_v24  ;;  %v3703_v24 = vld [vmem:[#allocation48_spill] sm:$0xff] }
 0x1cd   : > { %1433 = vst.msk [vmem:[%s2894_s28 + $0x98] sm:$0xff] %vm1413_vm0, %v1367_v46  ;;  %1436 = vst.msk [vmem:[%s2894_s28 + $0xb0] sm:$0xff] %vm1413_vm0, %v1370_v0  ;;  %v1304_v50 = vmul.f32 %v2873_v47, %v1105_v49  ;;  %v1307_v12 = vmul.f32 %v2873_v47, %v1117_v5  ;;  %v984_v15 = vadd.f32 %v919_v63, %v590_v6 }
 0x1ce   : > { %v981_v46 = vadd.f32 %v916_v19, %v587_v56  ;;  %v921_v49 = vmul.f32 %v2856_v43, %v2761_v23  ;;  %v920_v23 = vmul.f32 %v2856_v43, %v2759_v26  ;;  %v3705_v26 = vld [vmem:[#allocation50_spill] sm:$0xff]  ;;  %v3706_v19 = vld [vmem:[#allocation47_spill] sm:$0xff] }
 0x1cf   : > { %v1369_v51 = vadd.f32 %v1304_v50, %v975_v52  ;;  %v1372_v11 = vadd.f32 %v1307_v12, %v978_v1  ;;  %v589_v50 = vmul.f32 %v2865_v58, %v3702_v45  ;;  %v592_v12 = vmul.f32 %v2865_v58, %v3703_v24 }
 0x1d0   : > { %v1113_v8 = vpop.permute.xlu1 %1112  ;;  %v1125_v54 = vpop.permute.xlu0 %1124  ;;  %v594_v42 = vmul.f32 %v2865_v58, %v3705_v26  ;;  %v929_v45 = vmul.f32 %v2856_v43, %v2785_v31  ;;  %v928_v31 = vmul.f32 %v2856_v43, %v2783_v34  ;;  %v3713_v34 = vld [vmem:[#allocation58_spill] sm:$0xff] }
 0x1d1   : > { %1435 = vst.msk [vmem:[%s2894_s28 + $0xa8] sm:$0xff] %vm1413_vm0, %v1369_v51  ;;  %1438 = vst.msk [vmem:[%s2894_s28 + $0xc0] sm:$0xff] %vm1413_vm0, %v1372_v11  ;;  %v1306_v39 = vmul.f32 %v2873_v47, %v1113_v8  ;;  %v1309_v7 = vmul.f32 %v2873_v47, %v1125_v54  ;;  %v983_v18 = vadd.f32 %v918_v21, %v589_v50  ;;  %v3704_v54 = vld [vmem:[#allocation45_spill] sm:$0xff] }
 0x1d2   : > { %v986_v11 = vadd.f32 %v921_v49, %v592_v12  ;;  %v3710_v12 = vld [vmem:[#allocation51_spill] sm:$0xff] }
 0x1d3   : > { %v1371_v3 = vadd.f32 %v1306_v39, %v977_v60  ;;  %v1374_v41 = vadd.f32 %v1309_v7, %v980_v4  ;;  %v923_v60 = vmul.f32 %v2856_v43, %v2767_v25  ;;  %v591_v4 = vmul.f32 %v2865_v58, %v3704_v54 }
 0x1d4   : > { %v1121_v13 = vpop.permute.xlu1 %1120  ;;  %v1133_v53 = vpop.permute.xlu0 %1132  ;;  %v922_v25 = vmul.f32 %v2856_v43, %v2765_v28  ;;  %v3707_v28 = vld [vmem:[#allocation52_spill] sm:$0xff] }
 0x1d5   : > { %1437 = vst.msk [vmem:[%s2894_s28 + $0xb8] sm:$0xff] %vm1413_vm0, %v1371_v3  ;;  %1440 = vst.msk [vmem:[%s2894_s28 + $0xd0] sm:$0xff] %vm1413_vm0, %v1374_v41  ;;  %v1308_v10 = vmul.f32 %v2873_v47, %v1121_v13  ;;  %v1311_v57 = vmul.f32 %v2873_v47, %v1133_v53  ;;  %v985_v61 = vadd.f32 %v920_v23, %v591_v4  ;;  %v3712_v4 = vld [vmem:[#allocation53_spill] sm:$0xff] }
 0x1d6   : > { %v988_v55 = vadd.f32 %v923_v60, %v594_v42  ;;  %v925_v3 = vmul.f32 %v2856_v43, %v2773_v27  ;;  %v593_v13 = vmul.f32 %v2865_v58, %v3706_v19  ;;  %v596_v53 = vmul.f32 %v2865_v58, %v3707_v28 }
 0x1d7   : > { %v1373_v16 = vadd.f32 %v1308_v10, %v979_v62  ;;  %v1376_v9 = vadd.f32 %v1311_v57, %v982_v2  ;;  %v924_v27 = vmul.f32 %v2856_v43, %v2771_v30  ;;  %v3709_v30 = vld [vmem:[#allocation54_spill] sm:$0xff]  ;;  %v599_v26 = vmul.f32 %v2865_v58, %v3712_v4 }
 0x1d8   : > { %v1129_v0 = vpop.permute.xlu1 %1128  ;;  %v1141_v52 = vpop.permute.xlu0 %1140  ;;  %v987_v10 = vadd.f32 %v922_v25, %v593_v13  ;;  %v990_v56 = vadd.f32 %v925_v3, %v596_v53  ;;  %v598_v21 = vmul.f32 %v2865_v58, %v3709_v30  ;;  %v602_v42 = vmul.f32 %v2865_v58, %v3713_v34 }
 0x1d9   : > { %1439 = vst.msk [vmem:[%s2894_s28 + $0xc8] sm:$0xff] %vm1413_vm0, %v1373_v16  ;;  %1442 = vst.msk [vmem:[%s2894_s28 + $0xe0] sm:$0xff] %vm1413_vm0, %v1376_v9  ;;  %v1310_v5 = vmul.f32 %v2873_v47, %v1129_v0  ;;  %v1313_v1 = vmul.f32 %v2873_v47, %v1141_v52  ;;  %v3708_v9 = vld [vmem:[#allocation49_spill] sm:$0xff] }
 0x1db   : > { %v1375_v40 = vadd.f32 %v1310_v5, %v981_v46  ;;  %v1378_v48 = vadd.f32 %v1313_v1, %v984_v15  ;;  %v595_v46 = vmul.f32 %v2865_v58, %v3708_v9  ;;  %v992_v1 = vadd.f32 %v927_v22, %v598_v21  ;;  %v3716_v22 = vld [vmem:[#allocation57_spill] sm:$0xff]  ;;  %v3718_v21 = vld [vmem:[#allocation3_spill] sm:$0xff] }
 0x1dc   : > { %v1137_v59 = vpop.permute.xlu1 %1136  ;;  %v1149_v51 = vpop.permute.xlu0 %1148 }
 0x1dd   : > { %1441 = vst.msk [vmem:[%s2894_s28 + $0xd8] sm:$0xff] %vm1413_vm0, %v1375_v40  ;;  %1444 = vst.msk [vmem:[%s2894_s28 + $0xf0] sm:$0xff] %vm1413_vm0, %v1378_v48  ;;  %v1312_v17 = vmul.f32 %v2873_v47, %v1137_v59  ;;  %v1315_v8 = vmul.f32 %v2873_v47, %v1149_v51  ;;  %v989_v15 = vadd.f32 %v924_v27, %v595_v46 }
 0x1de   : > { %v597_v40 = vmul.f32 %v2865_v58, %v3710_v12  ;;  %v600_v48 = vmul.f32 %v2865_v58, %v3711_v32 }
 0x1df   : > { %v1377_v39 = vadd.f32 %v1312_v17, %v983_v18  ;;  %v1380_v7 = vadd.f32 %v1315_v8, %v986_v11  ;;  %v931_v17 = vmul.f32 %v2856_v43, %v2791_v33  ;;  %v930_v33 = vmul.f32 %v2856_v43, %v2789_v36  ;;  %v3715_v36 = vld [vmem:[#allocation60_spill] sm:$0xff] }
 0x1e0   : > { %v1145_v14 = vpop.permute.xlu1 %1144  ;;  %v1157_v20 = vpop.permute.xlu0 %1156  ;;  %v991_v59 = vadd.f32 %v926_v29, %v597_v40  ;;  %v994_v60 = vadd.f32 %v929_v45, %v600_v48  ;;  %v604_v13 = vmul.f32 %v2865_v58, %v3715_v36  ;;  %v3719_v29 = vld [vmem:[#allocation79_spill] sm:$0xff] }
 0x1e1   : > { %1443 = vst.msk [vmem:[%s2894_s28 + $0xe8] sm:$0xff] %vm1413_vm0, %v1377_v39  ;;  %1446 = vst.msk [vmem:[%s2894_s28 + $0x100] sm:$0xff] %vm1413_vm0, %v1380_v7  ;;  %v1314_v41 = vmul.f32 %v2873_v47, %v1145_v14  ;;  %v1317_v62 = vmul.f32 %v2873_v47, %v1157_v20  ;;  %v996_v20 = vadd.f32 %v931_v17, %v602_v42  ;;  %v3720_v45 = vld [vmem:[#allocation59_spill] sm:$0xff] }
 0x1e3   : > { %v1379_v2 = vadd.f32 %v1314_v41, %v985_v61  ;;  %v1382_v63 = vadd.f32 %v1317_v62, %v988_v55  ;;  %v993_v61 = vadd.f32 %v928_v31, %v599_v26  ;;  %v933_v55 = vmul.f32 %v2856_v43, %v2797_v35  ;;  %v3714_v62 = vld [vmem:[#allocation55_spill] sm:$0xff]  ;;  %v3725_v26 = vld [vmem:[#allocation66_spill] sm:$0xff] }
 0x1e4   : > { %v1153_v57 = vpop.permute.xlu1 %1152  ;;  %v1165_v44 = vpop.permute.xlu0 %1164  ;;  %v601_v19 = vmul.f32 %v2865_v58, %v3714_v62  ;;  %v932_v35 = vmul.f32 %v2856_v43, %v2795_v38  ;;  %v3717_v38 = vld [vmem:[#allocation62_spill] sm:$0xff]  ;;  %v610_v34 = vmul.f32 %v2865_v58, %v3725_v26 }
 0x1e5   : > { %1445 = vst.msk [vmem:[%s2894_s28 + $0xf8] sm:$0xff] %vm1413_vm0, %v1379_v2  ;;  %1448 = vst.msk [vmem:[%s2894_s28 + $0x110] sm:$0xff] %vm1413_vm0, %v1382_v63  ;;  %v1316_v6 = vmul.f32 %v2873_v47, %v1153_v57  ;;  %v1319_v16 = vmul.f32 %v2873_v47, %v1165_v44  ;;  %v998_v27 = vadd.f32 %v933_v55, %v604_v13  ;;  %v3727_v55 = vld [vmem:[#allocation83_spill] sm:$0xff]  ;;  %v3729_v13 = vld [vmem:[#allocation68_spill] sm:$0xff] }
 0x1e6   : > { %v995_v2 = vadd.f32 %v930_v33, %v601_v19  ;;  %v935_v57 = vmul.f32 %v2856_v43, %v2803_v37  ;;  %v934_v37 = vmul.f32 %v2856_v43, %v3718_v21  ;;  %v3728_v19 = vld [vmem:[#allocation63_spill] sm:$0xff] }
 0x1e7   : > { %v1381_v0 = vadd.f32 %v1316_v6, %v987_v10  ;;  %v1384_v52 = vadd.f32 %v1319_v16, %v990_v56  ;;  %v603_v6 = vmul.f32 %v2865_v58, %v3716_v22  ;;  %v606_v16 = vmul.f32 %v2865_v58, %v3717_v38 }
 0x1e8   : > { %v1161_v49 = vpop.permute.xlu1 %1160  ;;  %v1173_v5 = vpop.permute.xlu0 %1172  ;;  %v609_v36 = vmul.f32 %v2865_v58, %v3728_v19 }
 0x1e9   : > { %1447 = vst.msk [vmem:[%s2894_s28 + $0x108] sm:$0xff] %vm1413_vm0, %v1381_v0  ;;  %1450 = vst.msk [vmem:[%s2894_s28 + $0x120] sm:$0xff] %vm1413_vm0, %v1384_v52  ;;  %v1318_v50 = vmul.f32 %v2873_v47, %v1161_v49  ;;  %v1321_v24 = vmul.f32 %v2873_v47, %v1173_v5  ;;  %v997_v30 = vadd.f32 %v932_v35, %v603_v6 }
 0x1ea   : > { %v937_v49 = vmul.f32 %v2856_v43, %v3719_v29 }
 0x1eb   : > { %v1383_v18 = vadd.f32 %v1318_v50, %v989_v15  ;;  %v1386_v23 = vadd.f32 %v1321_v24, %v992_v1  ;;  %v1000_v15 = vadd.f32 %v935_v57, %v606_v16  ;;  %v605_v50 = vmul.f32 %v2865_v58, %v3720_v45  ;;  %v3721_v24 = vld [vmem:[#allocation64_spill] sm:$0xff]  ;;  %v3732_v16 = vld [vmem:[#allocation65_spill] sm:$0xff] }
 0x1ec   : > { %v1169_v51 = vpop.permute.xlu1 %1168  ;;  %v1181_v11 = vpop.permute.xlu0 %1180  ;;  %v608_v12 = vmul.f32 %v2865_v58, %v3721_v24 }
 0x1ed   : > { %1449 = vst.msk [vmem:[%s2894_s28 + $0x118] sm:$0xff] %vm1413_vm0, %v1383_v18  ;;  %1452 = vst.msk [vmem:[%s2894_s28 + $0x130] sm:$0xff] %vm1413_vm0, %v1386_v23  ;;  %v1320_v8 = vmul.f32 %v2873_v47, %v1169_v51  ;;  %v1323_v54 = vmul.f32 %v2873_v47, %v1181_v11  ;;  %v999_v48 = vadd.f32 %v934_v37, %v605_v50  ;;  %v3722_v18 = vld [vmem:[#allocation78_spill] sm:$0xff]  ;;  %v3723_v11 = vld [vmem:[#allocation81_spill] sm:$0xff] }
 0x1ee   : > { %v936_v23 = vmul.f32 %v2856_v43, %v3722_v18  ;;  %v1002_v51 = vadd.f32 %v937_v49, %v608_v12  ;;  %v3736_v12 = vld [vmem:[#allocation67_spill] sm:$0xff] }
 0x1ef   : > { %v1385_v39 = vadd.f32 %v1320_v8, %v991_v59  ;;  %v1388_v7 = vadd.f32 %v1323_v54, %v994_v60  ;;  %v939_v60 = vmul.f32 %v2856_v43, %v3723_v11  ;;  %v3724_v54 = vld [vmem:[#allocation61_spill] sm:$0xff] }
 0x1f0   : > { %v1177_v25 = vpop.permute.xlu1 %1176  ;;  %v1189_v14 = vpop.permute.xlu0 %1188  ;;  %v607_v4 = vmul.f32 %v2865_v58, %v3724_v54 }
 0x1f1   : > { %1451 = vst.msk [vmem:[%s2894_s28 + $0x128] sm:$0xff] %vm1413_vm0, %v1385_v39  ;;  %1454 = vst.msk [vmem:[%s2894_s28 + $0x140] sm:$0xff] %vm1413_vm0, %v1388_v7  ;;  %v1322_v3 = vmul.f32 %v2873_v47, %v1177_v25  ;;  %v1325_v41 = vmul.f32 %v2873_v47, %v1189_v14 }
 0x1f2   : > { %v1001_v7 = vadd.f32 %v936_v23, %v607_v4 }
 0x1f3   : > { %v1387_v28 = vadd.f32 %v1322_v3, %v993_v61  ;;  %v1390_v53 = vadd.f32 %v1325_v41, %v996_v20  ;;  %v3726_v61 = vld [vmem:[#allocation80_spill] sm:$0xff]  ;;  %v1004_v20 = vadd.f32 %v939_v60, %v610_v34  ;;  %v941_v3 = vmul.f32 %v2856_v43, %v3727_v55  ;;  %v3740_v34 = vld [vmem:[#allocation69_spill] sm:$0xff] }
 0x1f4   : > { %v1185_v63 = vpop.permute.xlu1 %1184  ;;  %v1197_v10 = vpop.permute.xlu0 %1196  ;;  %v938_v33 = vmul.f32 %v2856_v43, %v3726_v61 }
 0x1f5   : > { %1453 = vst.msk [vmem:[%s2894_s28 + $0x138] sm:$0xff] %vm1413_vm0, %v1387_v28  ;;  %1456 = vst.msk [vmem:[%s2894_s28 + $0x150] sm:$0xff] %vm1413_vm0, %v1390_v53  ;;  %v1324_v44 = vmul.f32 %v2873_v47, %v1185_v63  ;;  %v1327_v56 = vmul.f32 %v2873_v47, %v1197_v10  ;;  %v612_v28 = vmul.f32 %v2865_v58, %v3729_v13  ;;  %v3730_v63 = vld [vmem:[#allocation82_spill] sm:$0xff] }
 0x1f6   : > { %v1003_v35 = vadd.f32 %v938_v33, %v609_v36  ;;  %v940_v10 = vmul.f32 %v2856_v43, %v3730_v63 }
 0x1f7   : > { %v1389_v9 = vadd.f32 %v1324_v44, %v995_v2  ;;  %v1392_v46 = vadd.f32 %v1327_v56, %v998_v27  ;;  %v1006_v44 = vadd.f32 %v941_v3, %v612_v28  ;;  %v3731_v56 = vld [vmem:[#allocation85_spill] sm:$0xff]  ;;  %v3744_v28 = vld [vmem:[#allocation71_spill] sm:$0xff] }
 0x1f8   : > { %v1193_v0 = vpop.permute.xlu1 %1192  ;;  %v1205_v52 = vpop.permute.xlu0 %1204  ;;  %v943_v22 = vmul.f32 %v2856_v43, %v3731_v56 }
 0x1f9   : > { %1455 = vst.msk [vmem:[%s2894_s28 + $0x148] sm:$0xff] %vm1413_vm0, %v1389_v9  ;;  %1458 = vst.msk [vmem:[%s2894_s28 + $0x160] sm:$0xff] %vm1413_vm0, %v1392_v46  ;;  %v1326_v5 = vmul.f32 %v2873_v47, %v1193_v0  ;;  %v1329_v1 = vmul.f32 %v2873_v47, %v1205_v52  ;;  %v611_v9 = vmul.f32 %v2865_v58, %v3732_v16  ;;  %v3733_v46 = vld [vmem:[#allocation70_spill] sm:$0xff]  ;;  %v3734_v52 = vld [vmem:[#allocation84_spill] sm:$0xff] }
 0x1fb   : > { %v1391_v40 = vadd.f32 %v1326_v5, %v997_v30  ;;  %v1394_v32 = vadd.f32 %v1329_v1, %v1000_v15  ;;  %v614_v30 = vmul.f32 %v2865_v58, %v3733_v46  ;;  %v1005_v0 = vadd.f32 %v940_v10, %v611_v9  ;;  %v3735_v1 = vld [vmem:[#allocation7_spill] sm:$0xff] }
 0x1fc   : > { %v1201_v59 = vpop.permute.xlu1 %1200  ;;  %v1213_v31 = vpop.permute.xlu0 %1212  ;;  %v942_v15 = vmul.f32 %v2856_v43, %v3734_v52  ;;  %v945_v45 = vmul.f32 %v2856_v43, %v3735_v1 }
 0x1fd   : > { %1457 = vst.msk [vmem:[%s2894_s28 + $0x158] sm:$0xff] %vm1413_vm0, %v1391_v40  ;;  %1460 = vst.msk [vmem:[%s2894_s28 + $0x170] sm:$0xff] %vm1413_vm0, %v1394_v32  ;;  %v1328_v17 = vmul.f32 %v2873_v47, %v1201_v59  ;;  %v1331_v8 = vmul.f32 %v2873_v47, %v1213_v31  ;;  %v1008_v5 = vadd.f32 %v943_v22, %v614_v30  ;;  %v3737_v32 = vld [vmem:[#allocation72_spill] sm:$0xff]  ;;  %v3748_v30 = vld [vmem:[#allocation73_spill] sm:$0xff] }
 0x1fe   : > { %v613_v40 = vmul.f32 %v2865_v58, %v3736_v12  ;;  %v3738_v31 = vld [vmem:[#allocation4_spill] sm:$0xff] }
 0x1ff   : > { %v1393_v42 = vadd.f32 %v1328_v17, %v999_v48  ;;  %v1396_v39 = vadd.f32 %v1331_v8, %v1002_v51  ;;  %v616_v48 = vmul.f32 %v2865_v58, %v3737_v32  ;;  %v944_v51 = vmul.f32 %v2856_v43, %v3738_v31  ;;  %v3739_v8 = vld [vmem:[#allocation9_spill] sm:$0xff] }
 0x200   : > { %v1209_v25 = vpop.permute.xlu1 %1208  ;;  %v1221_v14 = vpop.permute.xlu0 %1220  ;;  %v1007_v59 = vadd.f32 %v942_v15, %v613_v40  ;;  %v947_v54 = vmul.f32 %v2856_v43, %v3739_v8  ;;  %v3754_v8 = vld [vmem:[#allocation10_spill] sm:$0xff] }
 0x201   : > { %1459 = vst.msk [vmem:[%s2894_s28 + $0x168] sm:$0xff] %vm1413_vm0, %v1393_v42  ;;  %1462 = vst.msk [vmem:[%s2894_s28 + $0x180] sm:$0xff] %vm1413_vm0, %v1396_v39  ;;  %v1330_v41 = vmul.f32 %v2873_v47, %v1209_v25  ;;  %v1333_v62 = vmul.f32 %v2873_v47, %v1221_v14  ;;  %v1010_v17 = vadd.f32 %v945_v45, %v616_v48  ;;  %v3741_v39 = vld [vmem:[#allocation74_spill] sm:$0xff]  ;;  %v3742_v14 = vld [vmem:[#allocation5_spill] sm:$0xff] }
 0x202   : > { %v615_v42 = vmul.f32 %v2865_v58, %v3740_v34  ;;  %v3752_v48 = vld [vmem:[#allocation11_spill] sm:$0xff] }
 0x203   : > { %v1395_v53 = vadd.f32 %v1330_v41, %v1001_v7  ;;  %v1398_v2 = vadd.f32 %v1333_v62, %v1004_v20  ;;  %v618_v7 = vmul.f32 %v2865_v58, %v3741_v39  ;;  %v946_v20 = vmul.f32 %v2856_v43, %v3742_v14  ;;  %v3743_v62 = vld [vmem:[#allocation86_spill] sm:$0xff] }
 0x204   : > { %v1217_v27 = vpop.permute.xlu1 %1216  ;;  %v1229_v57 = vpop.permute.xlu0 %1228  ;;  %v1009_v25 = vadd.f32 %v944_v51, %v615_v42  ;;  %v949_v19 = vmul.f32 %v2856_v43, %v3743_v62  ;;  %v3755_v42 = vld [vmem:[#allocation13_spill] sm:$0xff] }
 0x205   : > { %1461 = vst.msk [vmem:[%s2894_s28 + $0x178] sm:$0xff] %vm1413_vm0, %v1395_v53  ;;  %1464 = vst.msk [vmem:[%s2894_s28 + $0x190] sm:$0xff] %vm1413_vm0, %v1398_v2  ;;  %v1332_v6 = vmul.f32 %v2873_v47, %v1217_v27  ;;  %v1335_v38 = vmul.f32 %v2873_v47, %v1229_v57  ;;  %v1012_v41 = vadd.f32 %v947_v54, %v618_v7  ;;  %v3745_v2 = vld [vmem:[#allocation75_spill] sm:$0xff]  ;;  %v3746_v57 = vld [vmem:[#allocation6_spill] sm:$0xff] }
 0x206   : > { %v617_v53 = vmul.f32 %v2865_v58, %v3744_v28  ;;  %v952_v54 = vmul.f32 %v2856_v43, %v3754_v8  ;;  %v623_v39 = vmul.f32 %v2865_v58, %v3755_v42 }
 0x207   : > { %v1397_v21 = vadd.f32 %v1332_v6, %v1003_v35  ;;  %v1400_v37 = vadd.f32 %v1335_v38, %v1006_v44  ;;  %v620_v35 = vmul.f32 %v2865_v58, %v3745_v2  ;;  %v948_v44 = vmul.f32 %v2856_v43, %v3746_v57  ;;  %v3747_v38 = vld [vmem:[#allocation87_spill] sm:$0xff] }
 0x208   : > { %v1225_v29 = vpop.permute.xlu1 %1224  ;;  %v1237_v49 = vpop.permute.xlu0 %1236  ;;  %v1011_v27 = vadd.f32 %v946_v20, %v617_v53  ;;  %v951_v16 = vmul.f32 %v2856_v43, %v3747_v38 }
 0x209   : > { %1463 = vst.msk [vmem:[%s2894_s28 + $0x188] sm:$0xff] %vm1413_vm0, %v1397_v21  ;;  %1466 = vst.msk [vmem:[%s2894_s28 + $0x1a0] sm:$0xff] %vm1413_vm0, %v1400_v37  ;;  %v1334_v50 = vmul.f32 %v2873_v47, %v1225_v29  ;;  %v1337_v24 = vmul.f32 %v2873_v47, %v1237_v49  ;;  %v1014_v6 = vadd.f32 %v949_v19, %v620_v35  ;;  %v3749_v37 = vld [vmem:[#allocation76_spill] sm:$0xff] }
 0x20a   : > { %v619_v21 = vmul.f32 %v2865_v58, %v3748_v30  ;;  %v3750_v49 = vld [vmem:[#allocation8_spill] sm:$0xff] }
 0x20b   : > { %v1399_v18 = vadd.f32 %v1334_v50, %v1005_v0  ;;  %v1402_v23 = vadd.f32 %v1337_v24, %v1008_v5  ;;  %v622_v0 = vmul.f32 %v2865_v58, %v3749_v37  ;;  %v950_v5 = vmul.f32 %v2856_v43, %v3750_v49  ;;  %v3751_v24 = vld [vmem:[#allocation88_spill] sm:$0xff] }
 0x20c   : > { %v1233_v11 = vpop.permute.xlu1 %1232  ;;  %v1245_v60 = vpop.permute.xlu0 %1244  ;;  %v1013_v29 = vadd.f32 %v948_v44, %v619_v21  ;;  %v953_v12 = vmul.f32 %v2856_v43, %v3751_v24 }
 0x20d   : > { %1465 = vst.msk [vmem:[%s2894_s28 + $0x198] sm:$0xff] %vm1413_vm0, %v1399_v18  ;;  %1468 = vst.msk [vmem:[%s2894_s28 + $0x1b0] sm:$0xff] %vm1413_vm0, %v1402_v23  ;;  %v1336_v4 = vmul.f32 %v2873_v47, %v1233_v11  ;;  %v1339_v26 = vmul.f32 %v2873_v47, %v1245_v60  ;;  %v1016_v50 = vadd.f32 %v951_v16, %v622_v0  ;;  %v3753_v23 = vld [vmem:[#allocation12_spill] sm:$0xff] }
 0x20e   : > { %v621_v18 = vmul.f32 %v2865_v58, %v3752_v48 }
 0x20f   : > { %v1401_v61 = vadd.f32 %v1336_v4, %v1007_v59  ;;  %v1404_v33 = vadd.f32 %v1339_v26, %v1010_v17  ;;  %v624_v59 = vmul.f32 %v2865_v58, %v3753_v23 }
 0x210   : > { %v1241_v55 = vpop.permute.xlu1 %1240  ;;  %v1253_v3 = vpop.permute.xlu0 %1252  ;;  %v1015_v11 = vadd.f32 %v950_v5, %v621_v18 }
 0x211   : > { %1467 = vst.msk [vmem:[%s2894_s28 + $0x1a8] sm:$0xff] %vm1413_vm0, %v1401_v61  ;;  %1470 = vst.msk [vmem:[%s2894_s28 + $0x1c0] sm:$0xff] %vm1413_vm0, %v1404_v33  ;;  %v1338_v36 = vmul.f32 %v2873_v47, %v1241_v55  ;;  %v1341_v13 = vmul.f32 %v2873_v47, %v1253_v3  ;;  %v1018_v4 = vadd.f32 %v953_v12, %v624_v59 }
 0x213   : > { %v1403_v63 = vadd.f32 %v1338_v36, %v1009_v25  ;;  %v1406_v10 = vadd.f32 %v1341_v13, %v1012_v41  ;;  %v1017_v25 = vadd.f32 %v952_v54, %v623_v39 }
 0x214   : > { %v1249_v56 = vpop.permute.xlu1 %1248  ;;  %v1261_v22 = vpop.permute.xlu0 %1260 }
 0x215   : > { %1469 = vst.msk [vmem:[%s2894_s28 + $0x1b8] sm:$0xff] %vm1413_vm0, %v1403_v63  ;;  %1472 = vst.msk [vmem:[%s2894_s28 + $0x1d0] sm:$0xff] %vm1413_vm0, %v1406_v10  ;;  %v1340_v9 = vmul.f32 %v2873_v47, %v1249_v56  ;;  %v1343_v46 = vmul.f32 %v2873_v47, %v1261_v22 }
 0x217   : > { %v1405_v52 = vadd.f32 %v1340_v9, %v1011_v27  ;;  %v1408_v15 = vadd.f32 %v1343_v46, %v1014_v6 }
 0x218   : > { %v1257_v1 = vpop.permute.xlu1 %1256  ;;  %v1269_v45 = vpop.permute.xlu0 %1268 }
 0x219   : > { %1471 = vst.msk [vmem:[%s2894_s28 + $0x1c8] sm:$0xff] %vm1413_vm0, %v1405_v52  ;;  %1474 = vst.msk [vmem:[%s2894_s28 + $0x1e0] sm:$0xff] %vm1413_vm0, %v1408_v15  ;;  %v1342_v40 = vmul.f32 %v2873_v47, %v1257_v1  ;;  %v1345_v32 = vmul.f32 %v2873_v47, %v1269_v45 }
 0x21b   : > { %v1407_v31 = vadd.f32 %v1342_v40, %v1013_v29  ;;  %v1410_v51 = vadd.f32 %v1345_v32, %v1016_v50 }
 0x21c   : > { %v1265_v60 = vpop.permute.xlu1 %1264  ;;  %v1277_v17 = vpop.permute.xlu0 %1276 }
 0x21d   : > { %1473 = vst.msk [vmem:[%s2894_s28 + $0x1d8] sm:$0xff] %vm1413_vm0, %v1407_v31  ;;  %1476 = vst.msk [vmem:[%s2894_s28 + $0x1f0] sm:$0xff] %vm1413_vm0, %v1410_v51  ;;  %v1344_v26 = vmul.f32 %v2873_v47, %v1265_v60  ;;  %v1347_v34 = vmul.f32 %v2873_v47, %v1277_v17 }
 0x21f   : > { %v1409_v7 = vadd.f32 %v1344_v26, %v1015_v11  ;;  %v1412_v61 = vadd.f32 %v1347_v34, %v1018_v4  ;;  %1485 = sbr.rel (!%p2198_p4) target bundleno = 622 (0x26e), region = 32 }
 0x220   : > { %v1273_v33 = vpop.permute.xlu1 %1272 }
 0x221   : > { %1475 = vst.msk [vmem:[%s2894_s28 + $0x1e8] sm:$0xff] %vm1413_vm0, %v1409_v7  ;;  %1478 = vst.msk [vmem:[%s2894_s28 + $0x200] sm:$0xff] %vm1413_vm0, %v1412_v61  ;;  %v1346_v43 = vmul.f32 %v2873_v47, %v1273_v33 }
 0x223   : > { %v1411_v14 = vadd.f32 %v1346_v43, %v1017_v25 }
 0x225   : > { %1477 = vst.msk [vmem:[%s2894_s28 + $0x1f8] sm:$0xff] %vm1413_vm0, %v1411_v14 }
 0x226   : > { %s3765_s29 = smov (!%p1488_p8, %s1487_s29), 65 }
 0x227   : > { %s1951_s6 = sshll.u32 %s3765_s29, 7 }
 0x228   : > { %p1954_p9 = scmp.eq.s32.totalorder %s1951_s6, 0 }
 0x229   : > { %s3342_s7 = sshrl.u32 (!%p1954_p9), %s3765_s29, 6 }
 0x22a   : > { %1496 = sbr.rel (%p1954_p9) target bundleno = 622 (0x26e), region = 36  ;;  %p1955_p10 = scmp.le.s32.totalorder (!%p1954_p9), %s3342_s7, 0 }
 0x231   : > { %1902 = sbr.rel (%p1955_p10) target bundleno = 601 (0x259), region = 112  ;;  %s3756_s8 = smov (!%p1955_p10), %s3336_s5 }
 0x232   : > { %s3757_s9 = smov (!%p1955_p10), %s2894_s28  ;;  %s3351_s11 = smov (!%p1955_p10), 0  }
 0x233   : > { %s3353_s12 = smov (!%p1955_p10), 0  }
 0x238 LB: >> { %v1684_v58 = vld [vmem:[%s2129_s9] sm:$0xff]  ;;  %v1686_v47 = vld [vmem:[%s2129_s9 + $0x8] sm:$0xff]  ;;  %v1688_v20 = vld [vmem:[%s2129_s9 + $0x10] sm:$0xff]  ;;  %s1812_s14 = sadd.s32 1, %s2133_s11  ;;  %s1678_s12 = sadd.s32 1, %s2137_s12   ;;  %s2137_s12 = sphi %s3353_s12, %s1678_s12   ;;  %s2133_s11 = sphi %s3351_s11, %s3760_s11   ;;  %s2129_s9 = sphi %s3757_s9, %s3759_s9   ;;  %s2125_s8 = sphi %s3756_s8, %s3758_s8  }
 0x239   : >> { %1685 = vst [vmem:[%s2125_s8] sm:$0xff] %v1684_v58  ;;  %1687 = vst [vmem:[%s2125_s8 + $0x8] sm:$0xff] %v1686_v47  ;;  %v1690_v55 = vld [vmem:[%s2129_s9 + $0x18] sm:$0xff]  ;;  %v1692_v3 = vld [vmem:[%s2129_s9 + $0x20] sm:$0xff]  ;;  %p1813_p11 = scmp.ge.s32.totalorder %s1812_s14, %s3342_s7  ;;  %p1677_p12 = scmp.ge.s32.totalorder %s1678_s12, %s3342_s7 }
 0x23a   : >> { %1689 = vst [vmem:[%s2125_s8 + $0x10] sm:$0xff] %v1688_v20  ;;  %v1694_v41 = vld [vmem:[%s2129_s9 + $0x28] sm:$0xff]  ;;  %1691 = vst [vmem:[%s2125_s8 + $0x18] sm:$0xff] %v1690_v55  ;;  %v1696_v62 = vld [vmem:[%s2129_s9 + $0x30] sm:$0xff] }
 0x23b   : >> { %1693 = vst [vmem:[%s2125_s8 + $0x20] sm:$0xff] %v1692_v3  ;;  %1695 = vst [vmem:[%s2125_s8 + $0x28] sm:$0xff] %v1694_v41  ;;  %v1698_v19 = vld [vmem:[%s2129_s9 + $0x38] sm:$0xff]  ;;  %v1700_v36 = vld [vmem:[%s2129_s9 + $0x40] sm:$0xff]  ;;  %s3767_s14 = smov (%p1813_p11, %s1812_s14), 0 }
 0x23c   : >> { %1697 = vst [vmem:[%s2125_s8 + $0x30] sm:$0xff] %v1696_v62  ;;  %1699 = vst [vmem:[%s2125_s8 + $0x38] sm:$0xff] %v1698_v19  ;;  %v1702_v13 = vld [vmem:[%s2129_s9 + $0x48] sm:$0xff]  ;;  %v1704_v28 = vld [vmem:[%s2129_s9 + $0x50] sm:$0xff]  ;;  %s1956_s15 = sshll.u32 %s3767_s14, 9  ;;  %s3760_s11 = smov %s3767_s14 }
 0x23d   : >> { %1701 = vst [vmem:[%s2125_s8 + $0x40] sm:$0xff] %v1700_v36  ;;  %v1706_v53 = vld [vmem:[%s2129_s9 + $0x58] sm:$0xff]  ;;  %1703 = vst [vmem:[%s2125_s8 + $0x48] sm:$0xff] %v1702_v13  ;;  %v1708_v2 = vld [vmem:[%s2129_s9 + $0x60] sm:$0xff]  ;;  %s3409_s17 = scalar_lea.vmem %s2894_s28, %s1956_s15 [#allocation2]   ;;  %s3412_s18 = scalar_lea.vmem %s3336_s5, %s1956_s15  }
 0x23e   : >> { %1705 = vst [vmem:[%s2125_s8 + $0x50] sm:$0xff] %v1704_v28  ;;  %1707 = vst [vmem:[%s2125_s8 + $0x58] sm:$0xff] %v1706_v53  ;;  %v1710_v35 = vld [vmem:[%s2129_s9 + $0x68] sm:$0xff]  ;;  %v1712_v63 = vld [vmem:[%s2129_s9 + $0x70] sm:$0xff] }
 0x23f   : >> { %1709 = vst [vmem:[%s2125_s8 + $0x60] sm:$0xff] %v1708_v2  ;;  %1711 = vst [vmem:[%s2125_s8 + $0x68] sm:$0xff] %v1710_v35  ;;  %v1714_v10 = vld [vmem:[%s2129_s9 + $0x78] sm:$0xff]  ;;  %v1716_v27 = vld [vmem:[%s2129_s9 + $0x80] sm:$0xff] }
 0x240   : >> { %1713 = vst [vmem:[%s2125_s8 + $0x70] sm:$0xff] %v1712_v63  ;;  %v1718_v57 = vld [vmem:[%s2129_s9 + $0x88] sm:$0xff]  ;;  %1715 = vst [vmem:[%s2125_s8 + $0x78] sm:$0xff] %v1714_v10  ;;  %v1720_v44 = vld [vmem:[%s2129_s9 + $0x90] sm:$0xff] }
 0x241   : >> { %1717 = vst [vmem:[%s2125_s8 + $0x80] sm:$0xff] %v1716_v27  ;;  %1719 = vst [vmem:[%s2125_s8 + $0x88] sm:$0xff] %v1718_v57  ;;  %v1722_v56 = vld [vmem:[%s2129_s9 + $0x98] sm:$0xff]  ;;  %v1724_v22 = vld [vmem:[%s2129_s9 + $0xa0] sm:$0xff] }
 0x242   : >> { %1721 = vst [vmem:[%s2125_s8 + $0x90] sm:$0xff] %v1720_v44  ;;  %1723 = vst [vmem:[%s2125_s8 + $0x98] sm:$0xff] %v1722_v56  ;;  %v1726_v6 = vld [vmem:[%s2129_s9 + $0xa8] sm:$0xff]  ;;  %v1728_v38 = vld [vmem:[%s2129_s9 + $0xb0] sm:$0xff] }
 0x243   : >> { %1725 = vst [vmem:[%s2125_s8 + $0xa0] sm:$0xff] %v1724_v22  ;;  %v1730_v16 = vld [vmem:[%s2129_s9 + $0xb8] sm:$0xff]  ;;  %1727 = vst [vmem:[%s2125_s8 + $0xa8] sm:$0xff] %v1726_v6  ;;  %v1732_v9 = vld [vmem:[%s2129_s9 + $0xc0] sm:$0xff] }
 0x244   : >> { %1729 = vst [vmem:[%s2125_s8 + $0xb0] sm:$0xff] %v1728_v38  ;;  %1731 = vst [vmem:[%s2125_s8 + $0xb8] sm:$0xff] %v1730_v16  ;;  %v1734_v46 = vld [vmem:[%s2129_s9 + $0xc8] sm:$0xff]  ;;  %v1736_v30 = vld [vmem:[%s2129_s9 + $0xd0] sm:$0xff] }
 0x245   : >> { %1733 = vst [vmem:[%s2125_s8 + $0xc0] sm:$0xff] %v1732_v9  ;;  %1735 = vst [vmem:[%s2125_s8 + $0xc8] sm:$0xff] %v1734_v46  ;;  %v1738_v21 = vld [vmem:[%s2129_s9 + $0xd8] sm:$0xff]  ;;  %v1740_v37 = vld [vmem:[%s2129_s9 + $0xe0] sm:$0xff] }
 0x246   : >> { %1737 = vst [vmem:[%s2125_s8 + $0xd0] sm:$0xff] %v1736_v30  ;;  %v1742_v0 = vld [vmem:[%s2129_s9 + $0xe8] sm:$0xff]  ;;  %1739 = vst [vmem:[%s2125_s8 + $0xd8] sm:$0xff] %v1738_v21  ;;  %v1744_v52 = vld [vmem:[%s2129_s9 + $0xf0] sm:$0xff] }
 0x247   : >> { %1741 = vst [vmem:[%s2125_s8 + $0xe0] sm:$0xff] %v1740_v37  ;;  %1743 = vst [vmem:[%s2125_s8 + $0xe8] sm:$0xff] %v1742_v0  ;;  %v1746_v15 = vld [vmem:[%s2129_s9 + $0xf8] sm:$0xff]  ;;  %v1748_v29 = vld [vmem:[%s2129_s9 + $0x100] sm:$0xff] }
 0x248   : >> { %1745 = vst [vmem:[%s2125_s8 + $0xf0] sm:$0xff] %v1744_v52  ;;  %1747 = vst [vmem:[%s2125_s8 + $0xf8] sm:$0xff] %v1746_v15  ;;  %v1750_v49 = vld [vmem:[%s2129_s9 + $0x108] sm:$0xff]  ;;  %v1752_v5 = vld [vmem:[%s2129_s9 + $0x110] sm:$0xff] }
 0x249   : >> { %1749 = vst [vmem:[%s2125_s8 + $0x100] sm:$0xff] %v1748_v29  ;;  %v1754_v1 = vld [vmem:[%s2129_s9 + $0x118] sm:$0xff]  ;;  %1751 = vst [vmem:[%s2125_s8 + $0x108] sm:$0xff] %v1750_v49  ;;  %v1756_v45 = vld [vmem:[%s2129_s9 + $0x120] sm:$0xff] }
 0x24a   : >> { %1753 = vst [vmem:[%s2125_s8 + $0x110] sm:$0xff] %v1752_v5  ;;  %1755 = vst [vmem:[%s2125_s8 + $0x118] sm:$0xff] %v1754_v1  ;;  %v1758_v50 = vld [vmem:[%s2129_s9 + $0x128] sm:$0xff]  ;;  %v1760_v24 = vld [vmem:[%s2129_s9 + $0x130] sm:$0xff] }
 0x24b   : >> { %1757 = vst [vmem:[%s2125_s8 + $0x120] sm:$0xff] %v1756_v45  ;;  %1759 = vst [vmem:[%s2125_s8 + $0x128] sm:$0xff] %v1758_v50  ;;  %v1762_v12 = vld [vmem:[%s2129_s9 + $0x138] sm:$0xff]  ;;  %v1764_v40 = vld [vmem:[%s2129_s9 + $0x140] sm:$0xff] }
 0x24c   : >> { %1761 = vst [vmem:[%s2125_s8 + $0x130] sm:$0xff] %v1760_v24  ;;  %v1766_v32 = vld [vmem:[%s2129_s9 + $0x148] sm:$0xff]  ;;  %1763 = vst [vmem:[%s2125_s8 + $0x138] sm:$0xff] %v1762_v12  ;;  %v1768_v48 = vld [vmem:[%s2129_s9 + $0x150] sm:$0xff] }
 0x24d   : >> { %1765 = vst [vmem:[%s2125_s8 + $0x140] sm:$0xff] %v1764_v40  ;;  %1767 = vst [vmem:[%s2125_s8 + $0x148] sm:$0xff] %v1766_v32  ;;  %v1770_v18 = vld [vmem:[%s2129_s9 + $0x158] sm:$0xff]  ;;  %v1772_v23 = vld [vmem:[%s2129_s9 + $0x160] sm:$0xff] }
 0x24e   : >> { %1769 = vst [vmem:[%s2125_s8 + $0x150] sm:$0xff] %v1768_v48  ;;  %1771 = vst [vmem:[%s2125_s8 + $0x158] sm:$0xff] %v1770_v18  ;;  %v1774_v59 = vld [vmem:[%s2129_s9 + $0x168] sm:$0xff]  ;;  %v1776_v31 = vld [vmem:[%s2129_s9 + $0x170] sm:$0xff] }
 0x24f   : >> { %1773 = vst [vmem:[%s2125_s8 + $0x160] sm:$0xff] %v1772_v23  ;;  %v1778_v51 = vld [vmem:[%s2129_s9 + $0x178] sm:$0xff]  ;;  %1775 = vst [vmem:[%s2125_s8 + $0x168] sm:$0xff] %v1774_v59  ;;  %v1780_v11 = vld [vmem:[%s2129_s9 + $0x180] sm:$0xff] }
 0x250   : >> { %1777 = vst [vmem:[%s2125_s8 + $0x170] sm:$0xff] %v1776_v31  ;;  %1779 = vst [vmem:[%s2125_s8 + $0x178] sm:$0xff] %v1778_v51  ;;  %v1782_v60 = vld [vmem:[%s2129_s9 + $0x188] sm:$0xff]  ;;  %v1784_v17 = vld [vmem:[%s2129_s9 + $0x190] sm:$0xff] }
 0x251   : >> { %1781 = vst [vmem:[%s2125_s8 + $0x180] sm:$0xff] %v1780_v11  ;;  %1783 = vst [vmem:[%s2125_s8 + $0x188] sm:$0xff] %v1782_v60  ;;  %v1786_v8 = vld [vmem:[%s2129_s9 + $0x198] sm:$0xff]  ;;  %v1788_v54 = vld [vmem:[%s2129_s9 + $0x1a0] sm:$0xff] }
 0x252   : >> { %1785 = vst [vmem:[%s2125_s8 + $0x190] sm:$0xff] %v1784_v17  ;;  %v1790_v4 = vld [vmem:[%s2129_s9 + $0x1a8] sm:$0xff]  ;;  %1787 = vst [vmem:[%s2125_s8 + $0x198] sm:$0xff] %v1786_v8  ;;  %v1792_v26 = vld [vmem:[%s2129_s9 + $0x1b0] sm:$0xff]  ;;  %1680 = sbr.rel (!%p1677_p12) target bundleno = 568 (0x238), region = 118 }
 0x253   : >> { %1789 = vst [vmem:[%s2125_s8 + $0x1a0] sm:$0xff] %v1788_v54  ;;  %1791 = vst [vmem:[%s2125_s8 + $0x1a8] sm:$0xff] %v1790_v4  ;;  %v1794_v34 = vld [vmem:[%s2129_s9 + $0x1b8] sm:$0xff]  ;;  %v1796_v42 = vld [vmem:[%s2129_s9 + $0x1c0] sm:$0xff] }
 0x254   : >> { %1793 = vst [vmem:[%s2125_s8 + $0x1b0] sm:$0xff] %v1792_v26  ;;  %1795 = vst [vmem:[%s2125_s8 + $0x1b8] sm:$0xff] %v1794_v34  ;;  %v1798_v39 = vld [vmem:[%s2129_s9 + $0x1c8] sm:$0xff]  ;;  %v1800_v7 = vld [vmem:[%s2129_s9 + $0x1d0] sm:$0xff] }
 0x255   : >> { %1797 = vst [vmem:[%s2125_s8 + $0x1c0] sm:$0xff] %v1796_v42  ;;  %v1802_v61 = vld [vmem:[%s2129_s9 + $0x1d8] sm:$0xff]  ;;  %1799 = vst [vmem:[%s2125_s8 + $0x1c8] sm:$0xff] %v1798_v39  ;;  %v1804_v33 = vld [vmem:[%s2129_s9 + $0x1e0] sm:$0xff] }
 0x256   : >> { %1801 = vst [vmem:[%s2125_s8 + $0x1d0] sm:$0xff] %v1800_v7  ;;  %1803 = vst [vmem:[%s2125_s8 + $0x1d8] sm:$0xff] %v1802_v61  ;;  %v1806_v25 = vld [vmem:[%s2129_s9 + $0x1e8] sm:$0xff]  ;;  %v1808_v43 = vld [vmem:[%s2129_s9 + $0x1f0] sm:$0xff] }
 0x257   : >> { %1805 = vst [vmem:[%s2125_s8 + $0x1e0] sm:$0xff] %v1804_v33  ;;  %1807 = vst [vmem:[%s2125_s8 + $0x1e8] sm:$0xff] %v1806_v25  ;;  %v1810_v14 = vld [vmem:[%s2129_s9 + $0x1f8] sm:$0xff]  ;;  %s3759_s9 = smov %s3409_s17 }
 0x258   : >> { %1809 = vst [vmem:[%s2125_s8 + $0x1f0] sm:$0xff] %v1808_v43  ;;  %1811 = vst [vmem:[%s2125_s8 + $0x1f8] sm:$0xff] %v1810_v14  ;;  %s3758_s8 = smov %s3412_s18 }
 0x259 PF: > { %s3517_s19 = sand.u32 63, %s3765_s29   ;;  %s1967_s20 = sshll.u32 %s3342_s7, 9 }
 0x25a   : > { %s1823_s21 = scalar_lea.vmem %s2894_s28, %s1967_s20 [#allocation2]   ;;  %s1825_s22 = scalar_lea.vmem %s3336_s5, %s1967_s20  }
 0x25b   : > { %p1961_p13 = scmp.le.s32.totalorder %s3517_s19, 0 }
 0x25c   : > { %s2139_s23 = smov (!%p1961_p13), %s1825_s22   ;;  %s2143_s24 = smov (!%p1961_p13), %s1823_s21  }
 0x25d   : > { %1916 = sbr.rel (%p1961_p13) target bundleno = 622 (0x26e), region = 123  ;;  %s2147_s25 = smov (!%p1961_p13), 0  }
 0x25e   : > { %s2151_s26 = smov (!%p1961_p13), 0  }
 0x264 LB: >> { %v1835_v58 = vld [vmem:[%s2145_s24] sm:$0xff]  ;;  %s1837_s27 = sadd.s32 1, %s2149_s25  ;;  %s1829_s26 = sadd.s32 1, %s2153_s26   ;;  %s2153_s26 = sphi %s2151_s26, %s1829_s26   ;;  %s2149_s25 = sphi %s2147_s25, %s2148_s25   ;;  %s2145_s24 = sphi %s2143_s24, %s1842_s24   ;;  %s2141_s23 = sphi %s2139_s23, %s1843_s23  }
 0x265   : >> { %1836 = vst [vmem:[%s2141_s23] sm:$0xff] %v1835_v58  ;;  %p1838_p0 = scmp.ge.s32.totalorder %s1837_s27, %s3517_s19  ;;  %p1828_p1 = scmp.ge.s32.totalorder %s1829_s26, %s3517_s19 }
 0x267   : >> { %s3769_s27 = smov (%p1838_p0, %s1837_s27), 0  ;;  %1831 = sbr.rel (!%p1828_p1) target bundleno = 612 (0x264), region = 129 }
 0x268   : >> { %s1962_s28 = sshll.u32 %s3769_s27, 3  ;;  %s2148_s25 = smov %s3769_s27  }
 0x269   : >> { %s1842_s24 = scalar_lea.vmem %s1823_s21, %s1962_s28 [#allocation2]   ;;  %s1843_s23 = scalar_lea.vmem %s1825_s22, %s1962_s28  }
 0x26e PF: > { %p9_p2 = scmp.ge.s32.totalorder %s2188_s13, 6   ;;  %s3761_s9 = smov %s2117_s10 }
 0x26f   : > { %s3762_s10 = smov %s2196_s16  ;;  %s3763_s11 = smov %s2188_s13 }
 0x270   :  { %11 = sbr.rel (!%p9_p2) target bundleno = 2 (0x2), region = 140 }

</bundles_post_ra>
